<compile_context>
chip_gen: v7x
topology: tpu7x:2x2x1
jax: 0.10.0
libtpu: 0.0.40
codegen_flags: <defaults>
</compile_context>

<pallas_src>
import functools

import jax
import jax.numpy as jnp
from jax.experimental import pallas as pl
from jax.experimental.pallas import tpu as pltpu


def _round_up(x: int, m: int) -> int:
    return ((x + m - 1) // m) * m


def _cdiv(a: int, b: int) -> int:
    return -(-a // b)


def _vmem_budget_bytes() -> int:
    """Generation-aware VMEM budget for tile sizing / vmem_limit_bytes.

    ~5/8 of physical VMEM: 40 MiB on v7x (64 MiB physical), 80 MiB on
    v5e/v6e (128 MiB physical).  Falls back to the smallest (v7x) if the
    hardware query is unavailable.
    """
    try:
        cap = int(pltpu.get_tpu_info().vmem_capacity_bytes)
    except Exception:
        cap = 64 * 1024 * 1024
    return min((cap * 5) // 8, 80 * 1024 * 1024)


def _choose_tile(padded_size: int, target: int, align: int):
    """Tile = multiple of `align`, close to `target`, minimal extra padding.

    `padded_size` must already be a multiple of `align`.  Returns
    (tile, total_padded_size, num_steps) with total = tile * num_steps.
    """
    target = max(align, _round_up(min(target, padded_size), align))
    steps = _cdiv(padded_size, target)
    tile = _round_up(_cdiv(padded_size, steps), align)
    return tile, tile * steps, steps


def _linear_relu_kernel_inplace(x_ref, w_ref, b_ref, o_ref):
    """f32 output: accumulate directly into the resident output block.

    x_ref: (tb, tk)  w_ref: (tk, tn)  b_ref: (1, tn) f32  o_ref: (tb, tn) f32.
    The output block index is constant along the K grid axis, so o_ref stays
    in VMEM across K steps and doubles as the accumulator (no scratch).
    """
    k = pl.program_id(2)

    @pl.when(k == 0)
    def _init():
        o_ref[...] = jnp.zeros_like(o_ref)

    o_ref[...] += jnp.dot(x_ref[...], w_ref[...],
                          preferred_element_type=jnp.float32)

    @pl.when(k == pl.num_programs(2) - 1)
    def _finalize():
        o_ref[...] = jnp.maximum(o_ref[...] + b_ref[...], 0.0)


def _linear_relu_kernel_acc(x_ref, w_ref, b_ref, o_ref, acc_ref):
    """Non-f32 output (e.g. bf16): f32 VMEM scratch accumulator, cast at end."""
    k = pl.program_id(2)

    @pl.when(k == 0)
    def _init():
        acc_ref[...] = jnp.zeros_like(acc_ref)

    acc_ref[...] += jnp.dot(x_ref[...], w_ref[...],
                            preferred_element_type=jnp.float32)

    @pl.when(k == pl.num_programs(2) - 1)
    def _finalize():
        y = jnp.maximum(acc_ref[...] + b_ref[...], 0.0)
        o_ref[...] = y.astype(o_ref.dtype)


@functools.partial(jax.jit, static_argnames=("tile_b", "tile_n", "tile_k"))
def linear_layer(x, w, b, *, tile_b=512, tile_n=512, tile_k=1024):
    """y = ReLU(x @ w + b).  x: (B, K), w: (K, N), b: (N,).

    Notes:
      * No dtype casting happens inside this wrapper.  To use the bf16 MXU
        path (recommended on v5e, v6e and v7x for bandwidth-bound shapes),
        pass x and w already in bf16; accumulation stays f32 and bias/ReLU
        are applied in f32 before the final cast.
      * Tile targets are clamped to a generation-aware VMEM budget and to
        the (minimally) padded problem size, so arbitrary B/K/N work and all
        kernel stores are full-width lane-dense vst.
    """
    B, K = x.shape
    Kw, N = w.shape
    assert Kw == K, (Kw, K)

    out_dtype = x.dtype
    x_bytes = jnp.dtype(x.dtype).itemsize
    w_bytes = jnp.dtype(w.dtype).itemsize
    o_bytes = jnp.dtype(out_dtype).itemsize
    use_acc = out_dtype != jnp.float32

    # Sublane alignment for the batch axis (bf16 packs 2 rows per sublane).
    b_align = {4: 8, 2: 16, 1: 32}.get(x_bytes, 8)

    # Minimal lane/sublane-dense padded sizes (pad first, then fit tiles).
    B0 = _round_up(B, b_align)
    K0 = _round_up(K, 128)
    N0 = _round_up(N, 128)

    budget = _vmem_budget_bytes()
    tgt_b, tgt_n, tgt_k = tile_b, tile_n, tile_k
    while True:
        tb, Bp, nb = _choose_tile(B0, tgt_b, b_align)
        tn, Np, nn = _choose_tile(N0, tgt_n, 128)
        tk, Kp, nk = _choose_tile(K0, tgt_k, 128)
        # Double-buffered x/w/out tiles (+ f32 acc scratch if used).
        footprint = 2 * (tb * tk * x_bytes + tk * tn * w_bytes
                         + tb * tn * o_bytes)
        if use_acc:
            footprint += tb * tn * 4
        if footprint <= budget - (4 << 20) or (
                tgt_k <= 256 and tgt_n <= 128 and tgt_b <= b_align):
            break
        if tgt_k > 256:
            tgt_k //= 2
        elif tgt_n > 128:
            tgt_n //= 2
        else:
            tgt_b = max(b_align, tgt_b // 2)

    # v7x has 2 TensorCores sharding the parallel grid axes: make sure there
    # are at least 2 parallel output tiles when the problem allows it.
    if nb * nn < 2:
        if Bp // b_align >= 2 and Bp >= Np:
            tb, Bp, nb = _choose_tile(
                B0, _round_up(_cdiv(Bp, 2), b_align), b_align)
        elif Np // 128 >= 2:
            tn, Np, nn = _choose_tile(N0, _round_up(_cdiv(Np, 2), 128), 128)

    # Zero-pad: padded rows/cols/contraction contribute exactly zero and the
    # padded output region is sliced away below.
    if (Bp, Kp) != (B, K):
        x = jnp.pad(x, ((0, Bp - B), (0, Kp - K)))
    if (Kp, Np) != (K, N):
        w = jnp.pad(w, ((0, Kp - K), (0, Np - N)))
    b2d = jnp.pad(b.astype(jnp.float32), (0, Np - N)).reshape(1, Np)

    grid = (Bp // tb, Np // tn, Kp // tk)

    cost = pl.CostEstimate(
        flops=2 * B * K * N,
        transcendentals=0,
        bytes_accessed=(B * K * x_bytes + K * N * w_bytes
                        + N * 4 + B * N * o_bytes),
    )

    if use_acc:
        kernel = _linear_relu_kernel_acc
        scratch_shapes = [pltpu.VMEM((tb, tn), jnp.float32)]
    else:
        kernel = _linear_relu_kernel_inplace
        scratch_shapes = []

    out_padded = pl.pallas_call(
        kernel,
        out_shape=jax.ShapeDtypeStruct((Bp, Np), out_dtype),
        grid_spec=pltpu.PrefetchScalarGridSpec(
            num_scalar_prefetch=0,
            grid=grid,
            in_specs=[
                pl.BlockSpec((tb, tk), lambda i, j, k: (i, k)),   # x tile
                pl.BlockSpec((tk, tn), lambda i, j, k: (k, j)),   # weight tile
                pl.BlockSpec((1, tn), lambda i, j, k: (0, j)),    # bias tile
            ],
            out_specs=pl.BlockSpec((tb, tn), lambda i, j, k: (i, j)),
            scratch_shapes=scratch_shapes,
        ),
        compiler_params=pltpu.CompilerParams(
            # B/N tiles are independent (megacore shards them on v7x);
            # K is the reduction axis and must stay sequential.
            dimension_semantics=("parallel", "parallel", "arbitrary"),
            vmem_limit_bytes=budget,
        ),
        cost_estimate=cost,
    )(x, w, b2d)

    return out_padded[:B, :N]


def jax_reference(x, w, b):
    return jnp.maximum(x @ w + b, 0.0)


if __name__ == "__main__":
    # Module defaults (in=784, out=10); batch large enough to exercise two
    # parallel B tiles (keeps both v7x TensorCores busy) with one 896-deep
    # K step (minimal padding of K=784).
    B, IN_FEATURES, OUT_FEATURES = 512, 784, 10

    key = jax.random.PRNGKey(0)
    kx, kw, kb = jax.random.split(key, 3)

    # Deterministic param init mimicking nn.Linear: U(-1/sqrt(in), 1/sqrt(in)).
    # PyTorch stores weight as (out, in); we keep the transposed (in, out)
    # layout so the kernel computes x @ W directly.
    bound = 1.0 / (IN_FEATURES ** 0.5)
    w = jax.random.uniform(kw, (IN_FEATURES, OUT_FEATURES),
                           minval=-bound, maxval=bound, dtype=jnp.float32)
    b = jax.random.uniform(kb, (OUT_FEATURES,),
                           minval=-bound, maxval=bound, dtype=jnp.float32)
    x = jax.random.normal(kx, (B, IN_FEATURES), dtype=jnp.float32)

    y = jax.block_until_ready(linear_layer(x, w, b))

    y_ref = jax_reference(x, w, b)
    assert y.shape == (B, OUT_FEATURES), y.shape
    assert jnp.allclose(y, y_ref, atol=2e-5, rtol=1e-5), "mismatch vs reference"

    print("KERNEL_OK")
</pallas_src>

<mosaic_0001>
module attributes {stable_mosaic.version = 11 : i64} {
  func.func @_linear_relu_kernel_inplace(%arg0: i32, %arg1: i32, %arg2: i32, %arg3: memref<256x896xf32, #tpu.memory_space<vmem>>, %arg4: memref<896x128xf32, #tpu.memory_space<vmem>>, %arg5: memref<1x128xf32, #tpu.memory_space<vmem>>, %arg6: memref<256x128xf32, #tpu.memory_space<vmem>>) attributes {dimension_semantics = [#tpu.dimension_semantics<parallel>, #tpu.dimension_semantics<parallel>, #tpu.dimension_semantics<arbitrary>], iteration_bounds = array<i64: 2, 1, 1>, scalar_prefetch = 0 : i64, scratch_operands = 0 : i64, tpu.core_type = #tpu.core_type<tc>, window_params = [{transform_indices = @transform_0, window_bounds = array<i64: 256, 896>}, {transform_indices = @transform_1, window_bounds = array<i64: 896, 128>}, {transform_indices = @transform_2, window_bounds = array<i64: 1, 128>}, {transform_indices = @transform_3, window_bounds = array<i64: 256, 128>}]} {
    %c0_i32 = arith.constant 0 : i32
    %0 = arith.cmpi eq, %arg2, %c0_i32 : i32
    %1 = arith.extui %0 : i1 to i32
    %c0_i32_0 = arith.constant 0 : i32
    %2 = arith.cmpi ne, %1, %c0_i32_0 : i32
    scf.if %2 {
      %cst_10 = arith.constant 0.000000e+00 : f32
      %12 = vector.broadcast %cst_10 : f32 to vector<256x128xf32>
      %c0_11 = arith.constant 0 : index
      %c0_12 = arith.constant 0 : index
      %13 = vector.load %arg6[%c0_11, %c0_12] : memref<256x128xf32, #tpu.memory_space<vmem>>, vector<256x128xf32>
      tpu.vector_store %arg6[%c0_11, %c0_12], %12 {strides = array<i32>} : memref<256x128xf32, #tpu.memory_space<vmem>>, vector<256x128xf32>,
    } else {
    }
    %c0 = arith.constant 0 : index
    %c0_1 = arith.constant 0 : index
    %3 = vector.load %arg6[%c0, %c0_1] : memref<256x128xf32, #tpu.memory_space<vmem>>, vector<256x128xf32>
    %c0_2 = arith.constant 0 : index
    %c0_3 = arith.constant 0 : index
    %4 = vector.load %arg3[%c0_2, %c0_3] : memref<256x896xf32, #tpu.memory_space<vmem>>, vector<256x896xf32>
    %c0_4 = arith.constant 0 : index
    %c0_5 = arith.constant 0 : index
    %5 = vector.load %arg4[%c0_4, %c0_5] : memref<896x128xf32, #tpu.memory_space<vmem>>, vector<896x128xf32>
    %cst = arith.constant dense<0.000000e+00> : vector<256x128xf32>
    %6 = tpu.matmul %4, %5, %cst {dimension_numbers = #tpu.dot_dimension_numbers<[1], [0], [0], [1], [0, 0, 1, 1], [], []>} : vector<256x896xf32>, vector<896x128xf32>, vector<256x128xf32> -> vector<256x128xf32>
    %7 = arith.addf %3, %6 : vector<256x128xf32>
    %c0_6 = arith.constant 0 : index
    %c0_7 = arith.constant 0 : index
    %8 = vector.load %arg6[%c0_6, %c0_7] : memref<256x128xf32, #tpu.memory_space<vmem>>, vector<256x128xf32>
    tpu.vector_store %arg6[%c0_6, %c0_7], %7 {strides = array<i32>} : memref<256x128xf32, #tpu.memory_space<vmem>>, vector<256x128xf32>,
    %c0_i32_8 = arith.constant 0 : i32
    %9 = arith.cmpi eq, %arg2, %c0_i32_8 : i32
    %10 = arith.extui %9 : i1 to i32
    %c0_i32_9 = arith.constant 0 : i32
    %11 = arith.cmpi ne, %10, %c0_i32_9 : i32
    scf.if %11 {
      %c0_10 = arith.constant 0 : index
      %c0_11 = arith.constant 0 : index
      %12 = vector.load %arg6[%c0_10, %c0_11] : memref<256x128xf32, #tpu.memory_space<vmem>>, vector<256x128xf32>
      %c0_12 = arith.constant 0 : index
      %c0_13 = arith.constant 0 : index
      %13 = vector.load %arg5[%c0_12, %c0_13] : memref<1x128xf32, #tpu.memory_space<vmem>>, vector<1x128xf32>
      %14 = vector.broadcast %13 : vector<1x128xf32> to vector<256x128xf32>
      %15 = arith.addf %12, %14 : vector<256x128xf32>
      %cst_14 = arith.constant 0.000000e+00 : f32
      %16 = vector.broadcast %cst_14 : f32 to vector<256x128xf32>
      %17 = arith.maximumf %15, %16 : vector<256x128xf32>
      %c0_15 = arith.constant 0 : index
      %c0_16 = arith.constant 0 : index
      %18 = vector.load %arg6[%c0_15, %c0_16] : memref<256x128xf32, #tpu.memory_space<vmem>>, vector<256x128xf32>
      tpu.vector_store %arg6[%c0_15, %c0_16], %17 {strides = array<i32>} : memref<256x128xf32, #tpu.memory_space<vmem>>, vector<256x128xf32>,
    } else {
    }
    return
  }
  func.func @transform_0(%arg0: i32, %arg1: i32, %arg2: i32) -> (i32, i32) {
    %c0_i32 = arith.constant 0 : i32
    return %arg0, %arg2 : i32, i32
  }
  func.func @transform_1(%arg0: i32, %arg1: i32, %arg2: i32) -> (i32, i32) {
    %c0_i32 = arith.constant 0 : i32
    return %arg2, %arg1 : i32, i32
  }
  func.func @transform_2(%arg0: i32, %arg1: i32, %arg2: i32) -> (i32, i32) {
    %c0_i32 = arith.constant 0 : i32
    %c0_i32_0 = arith.constant 0 : i32
    return %c0_i32, %arg1 : i32, i32
  }
  func.func @transform_3(%arg0: i32, %arg1: i32, %arg2: i32) -> (i32, i32) {
    %c0_i32 = arith.constant 0 : i32
    return %arg0, %arg1 : i32, i32
  }
}

</mosaic_0001>

<bundles_post_ra>
// kernel: linear_layer.1
= control target key start
LH: loop header
LB: loop body
LE: loop exit
PB: predicated region body
PF: predicated region fallthrough
CT: control target
= control target key end

     0   :  { %s2405_s12 = smov 0   ;;  %s2407_s13 = smov 0   ;;  %s3342_s0 = inlined_call_operand.vmem [shape: f32[512,896], index: 0, kind: input, shape index: {}]   ;;  %s3343_s1 = inlined_call_operand.vmem [shape: f32[896,128], index: 1, kind: input, shape index: {}]   ;;  %s3344_s2 = inlined_call_operand.vmem [shape: f32[1,128], index: 2, kind: input, shape index: {}]   ;;  %s3345_s3 = inlined_call_operand.vmem [shape: f32[512,128], index: 3, kind: output, shape index: {}]  }
   0x1   :  { %s2409_s14 = smov 0  }
   0x2 LB: > { %s32_s15 = sadd.s32 1, %s2378_s13  ;;  %p1893_p0 = scmp.ge.s32.totalorder %s2382_s14, 1  ;;  %s2382_s14 = sphi %s2409_s14, %s13_s14   ;;  %s2378_s13 = sphi %s2407_s13, %s3347_s13   ;;  %s2374_s12 = sphi %s2405_s12, %s3346_s12  }
   0x3   : > { %p34_p1 = scmp.ge.s32.totalorder %s32_s15, 2  ;;  %p191_p2 = scmp.lt.s32.totalorder %s2382_s14, 3 }
   0x5   : > { %s3349_s15 = smov (%p34_p1, %s32_s15), 0  ;;  %p192_p3 = pnand %p1893_p0, %p191_p2 }
   0x6   : > { %v559_v0 = vld [vmem:[%s3343_s1] sm:$0xff] (!%p192_p3)  ;;  %v560_v1 = vld [vmem:[%s3343_s1 + $0x8] sm:$0xff] (!%p192_p3)  ;;  %v2384_v3 = vmov (!%p192_p3), 0.0|0.0   ;;  %v561_v6 = vld [vmem:[%s3343_s1 + $0x10] sm:$0xff] (!%p192_p3)  ;;  %s1894_s5 = sshll.u32 (!%p192_p3), %s2374_s12, 5 }
   0x7   : > { %195 = sbr.rel (%p192_p3) target bundleno = 514 (0x202), region = 32  ;;  %v591_v2 = vld [vmem:[%s3343_s1 + $0x100] sm:$0xff] (!%p192_p3)  ;;  %2029 = vmatprep.subr.bf16.mxu1 (!%p192_p3), %v2384_v3  ;;  %2077 = vmatprep.subr.bf16.mxu0 (!%p192_p3), %v2384_v3  ;;  %v2030_v4 = vpack.c.bf16 (!%p192_p3), %v560_v1, %v559_v0  ;;  %v592_v5 = vld [vmem:[%s3343_s1 + $0x108] sm:$0xff] (!%p192_p3)  ;;  %v562_v7 = vld [vmem:[%s3343_s1 + $0x18] sm:$0xff] (!%p192_p3)  ;;  %p236_p4 = scmp.lt.s32.totalorder (!%p192_p3), %s1894_s5, 63 }
   0x8   : > { %v2445_v8 = vpack.c.bf16 (!%p192_p3), %v592_v5, %v591_v2  ;;  %v593_v9 = vld [vmem:[%s3343_s1 + $0x110] sm:$0xff] (!%p192_p3)  ;;  %v594_v10 = vld [vmem:[%s3343_s1 + $0x118] sm:$0xff] (!%p192_p3)  ;;  %v2033_v11 = vpack.c.bf16 (!%p192_p3), %v562_v7, %v561_v6  ;;  %v563_v13 = vld [vmem:[%s3343_s1 + $0x20] sm:$0xff] (!%p192_p3) }
   0x9   : > { %2031 = vmatpush1.bf16.msra.mxu1 (!%p192_p3), %v2030_v4  ;;  %v2456_v12 = vpack.c.bf16 (!%p192_p3), %v594_v10, %v593_v9  ;;  %v564_v14 = vld [vmem:[%s3343_s1 + $0x28] sm:$0xff] (!%p192_p3)  ;;  %v595_v15 = vld [vmem:[%s3343_s1 + $0x120] sm:$0xff] (!%p192_p3)  ;;  %v565_v19 = vld [vmem:[%s3343_s1 + $0x30] sm:$0xff] (!%p192_p3) }
   0xa   : > { %2079 = vmatpush1.bf16.msra.mxu0 (!%p192_p3), %v2445_v8  ;;  %2032 = vmatprep.subr.bf16.mxu1 (!%p192_p3), %v2384_v3  ;;  %v596_v16 = vld [vmem:[%s3343_s1 + $0x128] sm:$0xff] (!%p192_p3)  ;;  %v2036_v17 = vpack.c.bf16 (!%p192_p3), %v564_v14, %v563_v13  ;;  %v566_v20 = vld [vmem:[%s3343_s1 + $0x38] sm:$0xff] (!%p192_p3)  ;;  %v597_v21 = vld [vmem:[%s3343_s1 + $0x130] sm:$0xff] (!%p192_p3) }
   0xb   : > { %2080 = vmatprep.subr.bf16.mxu0 (!%p192_p3), %v2384_v3  ;;  %v2473_v18 = vpack.c.bf16 (!%p192_p3), %v596_v16, %v595_v15  ;;  %v598_v22 = vld [vmem:[%s3343_s1 + $0x138] sm:$0xff] (!%p192_p3)  ;;  %v2039_v23 = vpack.c.bf16 (!%p192_p3), %v566_v20, %v565_v19  ;;  %v567_v25 = vld [vmem:[%s3343_s1 + $0x40] sm:$0xff] (!%p192_p3)  ;;  %v568_v26 = vld [vmem:[%s3343_s1 + $0x48] sm:$0xff] (!%p192_p3) }
   0xc   : > { %v2492_v24 = vpack.c.bf16 (!%p192_p3), %v598_v22, %v597_v21  ;;  %v599_v27 = vld [vmem:[%s3343_s1 + $0x140] sm:$0xff] (!%p192_p3)  ;;  %v600_v28 = vld [vmem:[%s3343_s1 + $0x148] sm:$0xff] (!%p192_p3)  ;;  %v2042_v29 = vpack.c.bf16 (!%p192_p3), %v568_v26, %v567_v25  ;;  %v569_v31 = vld [vmem:[%s3343_s1 + $0x50] sm:$0xff] (!%p192_p3) }
   0xd   : > { %2034 = vmatpush1.bf16.msra.mxu1 (!%p192_p3), %v2033_v11  ;;  %v2510_v30 = vpack.c.bf16 (!%p192_p3), %v600_v28, %v599_v27  ;;  %v570_v32 = vld [vmem:[%s3343_s1 + $0x58] sm:$0xff] (!%p192_p3)  ;;  %v601_v33 = vld [vmem:[%s3343_s1 + $0x150] sm:$0xff] (!%p192_p3)  ;;  %v571_v37 = vld [vmem:[%s3343_s1 + $0x60] sm:$0xff] (!%p192_p3) }
   0xe   : > { %2082 = vmatpush1.bf16.msra.mxu0 %v2456_v12  ;;  %2035 = vmatprep.subr.bf16.mxu1 %v2384_v3  ;;  %s3351_s5 = smov (!%p236_p4, %s1894_s5), 63  ;;  %v602_v34 = vld [vmem:[%s3343_s1 + $0x158] sm:$0xff]  ;;  %v2045_v35 = vpack.c.bf16 %v570_v32, %v569_v31  ;;  %v572_v38 = vld [vmem:[%s3343_s1 + $0x68] sm:$0xff]  ;;  %v603_v39 = vld [vmem:[%s3343_s1 + $0x160] sm:$0xff] }
   0xf   : > { %2083 = vmatprep.subr.bf16.mxu0 %v2384_v3  ;;  %s2333_s7 = smul.u32 56, %s3351_s5  ;;  %v2532_v36 = vpack.c.bf16 %v602_v34, %v601_v33  ;;  %v604_v40 = vld [vmem:[%s3343_s1 + $0x168] sm:$0xff]  ;;  %v2048_v43 = vpack.c.bf16 %v572_v38, %v571_v37  ;;  %v573_v45 = vld [vmem:[%s3343_s1 + $0x70] sm:$0xff]  ;;  %v574_v46 = vld [vmem:[%s3343_s1 + $0x78] sm:$0xff]  ;;  %s1897_s23 = sshll.u32 %s3351_s5, 3 }
  0x10   : > { %v2551_v44 = vpack.c.bf16 %v604_v40, %v603_v39  ;;  %v605_v47 = vld [vmem:[%s3343_s1 + $0x170] sm:$0xff]  ;;  %v606_v48 = vld [vmem:[%s3343_s1 + $0x178] sm:$0xff]  ;;  %v2051_v49 = vpack.c.bf16 %v574_v46, %v573_v45  ;;  %v575_v51 = vld [vmem:[%s3343_s1 + $0x80] sm:$0xff]  ;;  %s3224_s26 = scalar_lea.vmem %s3345_s3, %s1897_s23 }
  0x11   : > { %2037 = vmatpush1.bf16.msra.mxu1 %v2036_v17  ;;  %s2528_s21 = scalar_lea.vmem %s3342_s0, %s2333_s7  ;;  %v2568_v50 = vpack.c.bf16 %v606_v48, %v605_v47  ;;  %v576_v52 = vld [vmem:[%s3343_s1 + $0x88] sm:$0xff]  ;;  %v607_v53 = vld [vmem:[%s3343_s1 + $0x180] sm:$0xff]  ;;  %v577_v57 = vld [vmem:[%s3343_s1 + $0x90] sm:$0xff] }
  0x12   : > { %2085 = vmatpush1.bf16.msra.mxu0 %v2473_v18  ;;  %2038 = vmatprep.subr.bf16.mxu1 %v2384_v3  ;;  %v336_v41 = vld [vmem:[%s2528_s21 + $0x8] sm:$0xff]  ;;  %v338_v42 = vld [vmem:[%s2528_s21 + $0x18] sm:$0xff]  ;;  %v2054_v55 = vpack.c.bf16 %v576_v52, %v575_v51  ;;  %v609_v59 = vld [vmem:[%s3343_s1 + $0x190] sm:$0xff] }
  0x13   : > { %2086 = vmatprep.subr.bf16.mxu0 %v2384_v3  ;;  %735 = vmatprep.mubr.f32.mxu1 %v336_v41  ;;  %v608_v54 = vld [vmem:[%s3343_s1 + $0x188] sm:$0xff]  ;;  %v578_v58 = vld [vmem:[%s3343_s1 + $0x98] sm:$0xff]  ;;  %v579_v63 = vld [vmem:[%s3343_s1 + $0xa0] sm:$0xff] }
  0x14   : > { %960 = vmatprep.mubr.f32.mxu0 %v338_v42  ;;  %v2585_v56 = vpack.c.bf16 %v608_v54, %v607_v53  ;;  %v610_v60 = vld [vmem:[%s3343_s1 + $0x198] sm:$0xff]  ;;  %v2057_v61 = vpack.c.bf16 %v578_v58, %v577_v57  ;;  %v580_v0 = vld [vmem:[%s3343_s1 + $0xa8] sm:$0xff]  ;;  %v611_v1 = vld [vmem:[%s3343_s1 + $0x1a0] sm:$0xff] }
  0x15   : > { %2040 = vmatpush1.bf16.msra.mxu1 %v2039_v23  ;;  %v2602_v62 = vpack.c.bf16 %v610_v60, %v609_v59  ;;  %v612_v2 = vld [vmem:[%s3343_s1 + $0x1a8] sm:$0xff]  ;;  %v2060_v4 = vpack.c.bf16 %v580_v0, %v579_v63  ;;  %v581_v6 = vld [vmem:[%s3343_s1 + $0xb0] sm:$0xff]  ;;  %v582_v7 = vld [vmem:[%s3343_s1 + $0xb8] sm:$0xff] }
  0x16   : > { %2088 = vmatpush1.bf16.msra.mxu0 %v2492_v24  ;;  %2041 = vmatprep.subr.bf16.mxu1 %v2384_v3  ;;  %v2619_v5 = vpack.c.bf16 %v612_v2, %v611_v1  ;;  %v613_v9 = vld [vmem:[%s3343_s1 + $0x1b0] sm:$0xff]  ;;  %v614_v10 = vld [vmem:[%s3343_s1 + $0x1b8] sm:$0xff]  ;;  %v2063_v11 = vpack.c.bf16 %v582_v7, %v581_v6  ;;  %v583_v14 = vld [vmem:[%s3343_s1 + $0xc0] sm:$0xff] }
  0x17   : > { %2089 = vmatprep.subr.bf16.mxu0 %v2384_v3  ;;  %v2636_v13 = vpack.c.bf16 %v614_v10, %v613_v9  ;;  %v584_v15 = vld [vmem:[%s3343_s1 + $0xc8] sm:$0xff]  ;;  %v615_v16 = vld [vmem:[%s3343_s1 + $0x1c0] sm:$0xff]  ;;  %v585_v21 = vld [vmem:[%s3343_s1 + $0xd0] sm:$0xff] }
  0x18   : > { %v616_v17 = vld [vmem:[%s3343_s1 + $0x1c8] sm:$0xff]  ;;  %v2066_v19 = vpack.c.bf16 %v584_v15, %v583_v14  ;;  %v586_v22 = vld [vmem:[%s3343_s1 + $0xd8] sm:$0xff]  ;;  %v617_v23 = vld [vmem:[%s3343_s1 + $0x1d0] sm:$0xff] }
  0x19   : > { %2043 = vmatpush1.bf16.msra.mxu1 %v2042_v29  ;;  %v2653_v20 = vpack.c.bf16 %v616_v17, %v615_v16  ;;  %v618_v25 = vld [vmem:[%s3343_s1 + $0x1d8] sm:$0xff]  ;;  %v2069_v26 = vpack.c.bf16 %v586_v22, %v585_v21  ;;  %v587_v28 = vld [vmem:[%s3343_s1 + $0xe0] sm:$0xff]  ;;  %v588_v29 = vld [vmem:[%s3343_s1 + $0xe8] sm:$0xff] }
  0x1a   : > { %2091 = vmatpush1.bf16.msra.mxu0 %v2510_v30  ;;  %2044 = vmatprep.subr.bf16.mxu1 %v2384_v3  ;;  %v2670_v27 = vpack.c.bf16 %v618_v25, %v617_v23  ;;  %v619_v31 = vld [vmem:[%s3343_s1 + $0x1e0] sm:$0xff]  ;;  %v620_v32 = vld [vmem:[%s3343_s1 + $0x1e8] sm:$0xff]  ;;  %v2072_v33 = vpack.c.bf16 %v588_v29, %v587_v28  ;;  %v590_v37 = vld [vmem:[%s3343_s1 + $0xf8] sm:$0xff] }
  0x1b   : > { %2092 = vmatprep.subr.bf16.mxu0 %v2384_v3  ;;  %v2687_v34 = vpack.c.bf16 %v620_v32, %v619_v31  ;;  %v621_v38 = vld [vmem:[%s3343_s1 + $0x1f0] sm:$0xff]  ;;  %v622_v39 = vld [vmem:[%s3343_s1 + $0x1f8] sm:$0xff]  ;;  %v623_v42 = vld [vmem:[%s3343_s1 + $0x200] sm:$0xff] }
  0x1c   : > { %v2704_v41 = vpack.c.bf16 %v622_v39, %v621_v38  ;;  %v335_v45 = vld [vmem:[%s2528_s21] sm:$0xff]  ;;  %v337_v46 = vld [vmem:[%s2528_s21 + $0x10] sm:$0xff]  ;;  %v626_v51 = vld [vmem:[%s3343_s1 + $0x218] sm:$0xff] }
  0x1d   : > { %2046 = vmatpush1.bf16.msra.mxu1 %v2045_v35  ;;  %v589_v35 = vld [vmem:[%s3343_s1 + $0xf0] sm:$0xff]  ;;  %v343_v48 = vld [vmem:[%s2528_s21 + $0x40] sm:$0xff]  ;;  %v342_v53 = vld [vmem:[%s2528_s21 + $0x38] sm:$0xff] }
  0x1e   : > { %2094 = vmatpush1.bf16.msra.mxu0 %v2532_v36  ;;  %2047 = vmatprep.subr.bf16.mxu1 %v2384_v3  ;;  %v2075_v40 = vpack.c.bf16 %v590_v37, %v589_v35  ;;  %v345_v52 = vld [vmem:[%s2528_s21 + $0x50] sm:$0xff]  ;;  %v344_v54 = vld [vmem:[%s2528_s21 + $0x48] sm:$0xff]  ;;  %v627_v59 = vld [vmem:[%s3343_s1 + $0x220] sm:$0xff] }
  0x1f   : > { %2095 = vmatprep.subr.bf16.mxu0 %v2384_v3  ;;  %v352_v58 = vld [vmem:[%s2528_s21 + $0x88] sm:$0xff]  ;;  %v349_v60 = vld [vmem:[%s2528_s21 + $0x70] sm:$0xff]  ;;  %v359_v1 = vld [vmem:[%s2528_s21 + $0xc0] sm:$0xff] }
  0x20   : > { %v357_v63 = vld [vmem:[%s2528_s21 + $0xb0] sm:$0xff]  ;;  %v356_v6 = vld [vmem:[%s2528_s21 + $0xa8] sm:$0xff]  ;;  %v366_v10 = vld [vmem:[%s2528_s21 + $0xf8] sm:$0xff] }
  0x21   : > { %2049 = vmatpush1.bf16.msra.mxu1 %v2048_v43  ;;  %v624_v43 = vld [vmem:[%s3343_s1 + $0x208] sm:$0xff]  ;;  %v629_v2 = vld [vmem:[%s3343_s1 + $0x230] sm:$0xff]  ;;  %v363_v15 = vld [vmem:[%s2528_s21 + $0xe0] sm:$0xff] }
  0x22   : > { %2097 = vmatpush1.bf16.msra.mxu0 %v2551_v44  ;;  %2050 = vmatprep.subr.bf16.mxu1 %v2384_v3  ;;  %v2126_v47 = vpack.c.bf16 %v624_v43, %v623_v42  ;;  %v364_v7 = vld [vmem:[%s2528_s21 + $0xe8] sm:$0xff]  ;;  %v371_v16 = vld [vmem:[%s2528_s21 + $0x120] sm:$0xff]  ;;  %v633_v21 = vld [vmem:[%s3343_s1 + $0x250] sm:$0xff] }
  0x23   : > { %2098 = vmatprep.subr.bf16.mxu0 %v2384_v3  ;;  %v632_v14 = vld [vmem:[%s3343_s1 + $0x248] sm:$0xff]  ;;  %v634_v22 = vld [vmem:[%s3343_s1 + $0x258] sm:$0xff]  ;;  %v635_v29 = vld [vmem:[%s3343_s1 + $0x260] sm:$0xff] }
  0x24   : > { %v370_v23 = vld [vmem:[%s2528_s21 + $0x118] sm:$0xff]  ;;  %v372_v25 = vld [vmem:[%s2528_s21 + $0x128] sm:$0xff]  ;;  %v377_v32 = vld [vmem:[%s2528_s21 + $0x150] sm:$0xff] }
  0x25   : > { %2052 = vmatpush1.bf16.msra.mxu1 %v2051_v49  ;;  %v625_v49 = vld [vmem:[%s3343_s1 + $0x210] sm:$0xff]  ;;  %v380_v28 = vld [vmem:[%s2528_s21 + $0x168] sm:$0xff]  ;;  %v387_v37 = vld [vmem:[%s2528_s21 + $0x1a0] sm:$0xff] }
  0x26   : > { %2100 = vmatpush1.bf16.msra.mxu0 %v2568_v50  ;;  %2053 = vmatprep.subr.bf16.mxu1 %v2384_v3  ;;  %v2129_v57 = vpack.c.bf16 %v626_v51, %v625_v49  ;;  %v636_v31 = vld [vmem:[%s3343_s1 + $0x268] sm:$0xff]  ;;  %v637_v38 = vld [vmem:[%s3343_s1 + $0x270] sm:$0xff]  ;;  %v638_v39 = vld [vmem:[%s3343_s1 + $0x278] sm:$0xff] }
  0x27   : > { %2101 = vmatprep.subr.bf16.mxu0 %v2384_v3  ;;  %v2144_v35 = vpack.c.bf16 %v636_v31, %v635_v29  ;;  %v386_v42 = vld [vmem:[%s2528_s21 + $0x198] sm:$0xff]  ;;  %v2147_v43 = vpack.c.bf16 %v638_v39, %v637_v38  ;;  %v393_v49 = vld [vmem:[%s2528_s21 + $0x1d0] sm:$0xff]  ;;  %v399_v51 = vld [vmem:[%s2528_s21 + $0x200] sm:$0xff] }
  0x28   : > { %v435_v29 = vld [vmem:[%s2528_s21 + $0x320] sm:$0xff]  ;;  %v441_v31 = vld [vmem:[%s2528_s21 + $0x350] sm:$0xff]  ;;  %v656_v38 = vld [vmem:[%s3343_s1 + $0x308] sm:$0xff] }
  0x29   : > { %2055 = vmatpush1.bf16.msra.mxu1 %v2054_v55  ;;  %v350_v55 = vld [vmem:[%s2528_s21 + $0x78] sm:$0xff] }
  0x2a   : > { %2103 = vmatpush1.bf16.msra.mxu0 %v2585_v56  ;;  %2056 = vmatprep.subr.bf16.mxu1 %v2384_v3  ;;  %v442_v39 = vld [vmem:[%s2528_s21 + $0x358] sm:$0xff] }
  0x2b   : > { %2104 = vmatprep.subr.bf16.mxu0 %v2384_v3 }
  0x2d   : > { %2058 = vmatpush1.bf16.msra.mxu1 %v2057_v61  ;;  %v351_v61 = vld [vmem:[%s2528_s21 + $0x80] sm:$0xff] }
  0x2e   : > { %2106 = vmatpush1.bf16.msra.mxu0 %v2602_v62  ;;  %2059 = vmatprep.subr.bf16.mxu1 %v2384_v3 }
  0x2f   : > { %2107 = vmatprep.subr.bf16.mxu0 %v2384_v3 }
  0x31   : > { %2061 = vmatpush1.bf16.msra.mxu1 %v2060_v4  ;;  %v630_v4 = vld [vmem:[%s3343_s1 + $0x238] sm:$0xff] }
  0x32   : > { %2109 = vmatpush1.bf16.msra.mxu0 %v2619_v5  ;;  %2062 = vmatprep.subr.bf16.mxu1 %v2384_v3  ;;  %v2135_v9 = vpack.c.bf16 %v630_v4, %v629_v2  ;;  %v415_v2 = vld [vmem:[%s2528_s21 + $0x280] sm:$0xff]  ;;  %v646_v4 = vld [vmem:[%s3343_s1 + $0x2b8] sm:$0xff] }
  0x33   : > { %2110 = vmatprep.subr.bf16.mxu0 %v2384_v3 }
  0x35   : > { %2064 = vmatpush1.bf16.msra.mxu1 %v2063_v11  ;;  %v631_v11 = vld [vmem:[%s3343_s1 + $0x240] sm:$0xff] }
  0x36   : > { %2112 = vmatpush1.bf16.msra.mxu0 %v2636_v13  ;;  %2065 = vmatprep.subr.bf16.mxu1 %v2384_v3  ;;  %v2138_v17 = vpack.c.bf16 %v632_v14, %v631_v11  ;;  %v648_v11 = vld [vmem:[%s3343_s1 + $0x2c8] sm:$0xff]  ;;  %v419_v14 = vld [vmem:[%s2528_s21 + $0x2a0] sm:$0xff] }
  0x37   : > { %2113 = vmatprep.subr.bf16.mxu0 %v2384_v3 }
  0x39   : > { %2067 = vmatpush1.bf16.msra.mxu1 %v2066_v19  ;;  %v373_v19 = vld [vmem:[%s2528_s21 + $0x130] sm:$0xff] }
  0x3a   : > { %2115 = vmatpush1.bf16.msra.mxu0 %v2653_v20  ;;  %2068 = vmatprep.subr.bf16.mxu1 %v2384_v3 }
  0x3b   : > { %2116 = vmatprep.subr.bf16.mxu0 %v2384_v3 }
  0x3d   : > { %2070 = vmatpush1.bf16.msra.mxu1 %v2069_v26  ;;  %v2141_v26 = vpack.c.bf16 %v634_v22, %v633_v21  ;;  %v426_v21 = vld [vmem:[%s2528_s21 + $0x2d8] sm:$0xff]  ;;  %v428_v22 = vld [vmem:[%s2528_s21 + $0x2e8] sm:$0xff] }
  0x3e   : > { %2118 = vmatpush1.bf16.msra.mxu0 %v2670_v27  ;;  %2071 = vmatprep.subr.bf16.mxu1 %v2384_v3 }
  0x3f   : > { %2119 = vmatprep.subr.bf16.mxu0 %v2384_v3 }
  0x41   : > { %2073 = vmatpush1.bf16.msra.mxu1 %v2072_v33  ;;  %v379_v33 = vld [vmem:[%s2528_s21 + $0x160] sm:$0xff] }
  0x42   : > { %2121 = vmatpush1.bf16.msra.mxu0 %v2687_v34  ;;  %2074 = vmatprep.subr.bf16.mxu1 %v2384_v3 }
  0x43   : > { %2122 = vmatprep.subr.bf16.mxu0 %v2384_v3 }
  0x45   : > { %2076 = vmatpush1.bf16.msra.mxu1 %v2075_v40  ;;  %v384_v40 = vld [vmem:[%s2528_s21 + $0x188] sm:$0xff] }
  0x46   : > { %2124 = vmatpush1.bf16.msra.mxu0 %v2704_v41  ;;  %2205 = vmatprep.subr.bf16.mxu1 %v2384_v3 }
  0x47   : > { %2125 = vmatprep.subr.bf16.mxu0 %v2384_v3 }
  0x48   : > { %736 = vmatmul.mubr.f32.vlgmr.msra.gmra.mrb[0].mxu1 %v335_v45  ;;  %v394_v45 = vld [vmem:[%s2528_s21 + $0x1d8] sm:$0xff] }
  0x49   : > { %961 = vmatmul.mubr.f32.vlgmr.msra.gmra.mrb[0].mxu0 %v337_v46  ;;  %2221 = vmatpush1.bf16.msra.mxu1 %v2445_v8  ;;  %v628_v8 = vld [vmem:[%s3343_s1 + $0x228] sm:$0xff]  ;;  %v639_v46 = vld [vmem:[%s3343_s1 + $0x280] sm:$0xff] }
  0x4a   : > { %2127 = vmatpush1.bf16.msra.mxu0 %v2126_v47  ;;  %740 = vmatprep.mubr.f32.mxu1 %v343_v48  ;;  %v2132_v0 = vpack.c.bf16 %v628_v8, %v627_v59  ;;  %v640_v47 = vld [vmem:[%s3343_s1 + $0x288] sm:$0xff]  ;;  %v391_v48 = vld [vmem:[%s2528_s21 + $0x1c0] sm:$0xff] }
  0x4b   : > { %965 = vmatprep.mubr.f32.mxu0 %v345_v52  ;;  %2128 = vmatprep.subr.bf16.mxu0 %v2384_v3  ;;  %v2150_v52 = vpack.c.bf16 %v640_v47, %v639_v46  ;;  %v408_v8 = vld [vmem:[%s2528_s21 + $0x248] sm:$0xff]  ;;  %v455_v46 = vld [vmem:[%s2528_s21 + $0x3c0] sm:$0xff]  ;;  %v457_v47 = vld [vmem:[%s2528_s21 + $0x3d0] sm:$0xff] }
  0x4c   : > { %741 = vmatmul.mubr.f32.gmra.mrb[2].mxu1 %v342_v53  ;;  %2206 = vmatprep.subr.bf16.mxu1 %v2384_v3  ;;  %v401_v53 = vld [vmem:[%s2528_s21 + $0x210] sm:$0xff] }
  0x4d   : > { %966 = vmatmul.mubr.f32.gmra.mrb[2].mxu0 %v344_v54  ;;  %745 = vmatprep.mubr.f32.mxu1 %v350_v55  ;;  %v642_v54 = vld [vmem:[%s3343_s1 + $0x298] sm:$0xff] }
  0x4e   : > { %970 = vmatprep.mubr.f32.mxu0 %v352_v58  ;;  %2130 = vmatpush1.bf16.msra.mxu0 %v2129_v57  ;;  %v398_v55 = vld [vmem:[%s2528_s21 + $0x1f8] sm:$0xff]  ;;  %v400_v57 = vld [vmem:[%s2528_s21 + $0x208] sm:$0xff] }
  0x4f   : > { %2222 = vmatpush1.bf16.msra.mxu1 %v2456_v12  ;;  %2131 = vmatprep.subr.bf16.mxu0 %v2384_v3  ;;  %v358_v12 = vld [vmem:[%s2528_s21 + $0xb8] sm:$0xff] }
  0x50   : > { %746 = vmatmul.mubr.f32.gmra.mrb[4].mxu1 %v349_v60  ;;  %2207 = vmatprep.subr.bf16.mxu1 %v2384_v3  ;;  %v406_v58 = vld [vmem:[%s2528_s21 + $0x238] sm:$0xff]  ;;  %v644_v60 = vld [vmem:[%s3343_s1 + $0x2a8] sm:$0xff] }
  0x51   : > { %971 = vmatmul.mubr.f32.gmra.mrb[4].mxu0 %v351_v61  ;;  %750 = vmatprep.mubr.f32.mxu1 %v357_v63  ;;  %v405_v61 = vld [vmem:[%s2528_s21 + $0x230] sm:$0xff]  ;;  %v407_v63 = vld [vmem:[%s2528_s21 + $0x240] sm:$0xff] }
  0x52   : > { %975 = vmatprep.mubr.f32.mxu0 %v359_v1  ;;  %2133 = vmatpush1.bf16.msra.mxu0 %v2132_v0  ;;  %v413_v0 = vld [vmem:[%s2528_s21 + $0x270] sm:$0xff] }
  0x53   : > { %2223 = vmatpush1.bf16.msra.mxu1 %v2473_v18  ;;  %2134 = vmatprep.subr.bf16.mxu0 %v2384_v3  ;;  %v365_v18 = vld [vmem:[%s2528_s21 + $0xf0] sm:$0xff] }
  0x54   : > { %751 = vmatmul.mubr.f32.gmra.mrb[6].mxu1 %v356_v6  ;;  %2208 = vmatprep.subr.bf16.mxu1 %v2384_v3  ;;  %v412_v6 = vld [vmem:[%s2528_s21 + $0x268] sm:$0xff] }
  0x55   : > { %976 = vmatmul.mubr.f32.gmra.mrb[6].mxu0 %v358_v12  ;;  %755 = vmatprep.mubr.f32.mxu1 %v364_v7  ;;  %v414_v12 = vld [vmem:[%s2528_s21 + $0x278] sm:$0xff]  ;;  %v420_v7 = vld [vmem:[%s2528_s21 + $0x2a8] sm:$0xff] }
  0x56   : > { %980 = vmatprep.mubr.f32.mxu0 %v366_v10  ;;  %2136 = vmatpush1.bf16.msra.mxu0 %v2135_v9  ;;  %v422_v10 = vld [vmem:[%s2528_s21 + $0x2b8] sm:$0xff] }
  0x57   : > { %2137 = vmatprep.subr.bf16.mxu0 %v2384_v3  ;;  %2224 = vmatpush1.bf16.msra.mxu1 %v2492_v24  ;;  %v378_v24 = vld [vmem:[%s2528_s21 + $0x158] sm:$0xff] }
  0x58   : > { %756 = vmatmul.mubr.f32.gmra.mrb[8].mxu1 %v363_v15  ;;  %2209 = vmatprep.subr.bf16.mxu1 %v2384_v3  ;;  %v421_v15 = vld [vmem:[%s2528_s21 + $0x2b0] sm:$0xff] }
  0x59   : > { %981 = vmatmul.mubr.f32.gmra.mrb[8].mxu0 %v365_v18  ;;  %760 = vmatprep.mubr.f32.mxu1 %v371_v16  ;;  %v427_v18 = vld [vmem:[%s2528_s21 + $0x2e0] sm:$0xff] }
  0x5a   : > { %985 = vmatprep.mubr.f32.mxu0 %v373_v19  ;;  %2139 = vmatpush1.bf16.msra.mxu0 %v2138_v17  ;;  %v429_v17 = vld [vmem:[%s2528_s21 + $0x2f0] sm:$0xff]  ;;  %v650_v19 = vld [vmem:[%s3343_s1 + $0x2d8] sm:$0xff] }
  0x5b   : > { %2140 = vmatprep.subr.bf16.mxu0 %v2384_v3  ;;  %2225 = vmatpush1.bf16.msra.mxu1 %v2510_v30  ;;  %v385_v30 = vld [vmem:[%s2528_s21 + $0x190] sm:$0xff] }
  0x5c   : > { %761 = vmatmul.mubr.f32.gmra.mrb[10].mxu1 %v370_v23  ;;  %2210 = vmatprep.subr.bf16.mxu1 %v2384_v3  ;;  %v434_v23 = vld [vmem:[%s2528_s21 + $0x318] sm:$0xff] }
  0x5d   : > { %986 = vmatmul.mubr.f32.gmra.mrb[10].mxu0 %v372_v25  ;;  %765 = vmatprep.mubr.f32.mxu1 %v378_v24  ;;  %v436_v24 = vld [vmem:[%s2528_s21 + $0x328] sm:$0xff] }
  0x5e   : > { %990 = vmatprep.mubr.f32.mxu0 %v380_v28  ;;  %2142 = vmatpush1.bf16.msra.mxu0 %v2141_v26  ;;  %v652_v26 = vld [vmem:[%s3343_s1 + $0x2e8] sm:$0xff]  ;;  %v433_v28 = vld [vmem:[%s2528_s21 + $0x310] sm:$0xff] }
  0x5f   : > { %2143 = vmatprep.subr.bf16.mxu0 %v2384_v3  ;;  %2226 = vmatpush1.bf16.msra.mxu1 %v2532_v36  ;;  %v392_v36 = vld [vmem:[%s2528_s21 + $0x1c8] sm:$0xff] }
  0x60   : > { %766 = vmatmul.mubr.f32.gmra.mrb[12].mxu1 %v377_v32  ;;  %2211 = vmatprep.subr.bf16.mxu1 %v2384_v3 }
  0x61   : > { %991 = vmatmul.mubr.f32.gmra.mrb[12].mxu0 %v379_v33  ;;  %770 = vmatprep.mubr.f32.mxu1 %v385_v30  ;;  %v443_v33 = vld [vmem:[%s2528_s21 + $0x360] sm:$0xff]  ;;  %v654_v30 = vld [vmem:[%s3343_s1 + $0x2f8] sm:$0xff] }
  0x62   : > { %995 = vmatprep.mubr.f32.mxu0 %v387_v37  ;;  %2145 = vmatpush1.bf16.msra.mxu0 %v2144_v35  ;;  %v440_v35 = vld [vmem:[%s2528_s21 + $0x348] sm:$0xff]  ;;  %v655_v37 = vld [vmem:[%s3343_s1 + $0x300] sm:$0xff] }
  0x63   : > { %2146 = vmatprep.subr.bf16.mxu0 %v2384_v3  ;;  %2227 = vmatpush1.bf16.msra.mxu1 %v2551_v44  ;;  %v641_v44 = vld [vmem:[%s3343_s1 + $0x290] sm:$0xff] }
  0x64   : > { %771 = vmatmul.mubr.f32.gmra.mrb[14].mxu1 %v384_v40  ;;  %2212 = vmatprep.subr.bf16.mxu1 %v2384_v3  ;;  %v2153_v59 = vpack.c.bf16 %v642_v54, %v641_v44  ;;  %v468_v44 = vld [vmem:[%s2528_s21 + $0x428] sm:$0xff]  ;;  %v470_v54 = vld [vmem:[%s2528_s21 + $0x438] sm:$0xff] }
  0x65   : > { %996 = vmatmul.mubr.f32.gmra.mrb[14].mxu0 %v386_v42  ;;  %775 = vmatprep.mubr.f32.mxu1 %v392_v36  ;;  %v450_v42 = vld [vmem:[%s2528_s21 + $0x398] sm:$0xff]  ;;  %v2921_v36 = vpack.c.bf16 %v656_v38, %v655_v37  ;;  %v381_v37 = vld [vmem:[%s2528_s21 + $0x170] sm:$0xff] }
  0x66   : > { %1000 = vmatprep.mubr.f32.mxu0 %v394_v45  ;;  %2148 = vmatpush1.bf16.msra.mxu0 %v2147_v43  ;;  %v447_v43 = vld [vmem:[%s2528_s21 + $0x380] sm:$0xff]  ;;  %v449_v45 = vld [vmem:[%s2528_s21 + $0x390] sm:$0xff] }
  0x67   : > { %2149 = vmatprep.subr.bf16.mxu0 %v2384_v3  ;;  %2228 = vmatpush1.bf16.msra.mxu1 %v2568_v50  ;;  %v643_v50 = vld [vmem:[%s3343_s1 + $0x2a0] sm:$0xff]  ;;  %v553_v38 = vld [vmem:[%s2528_s21 + $0x6d0] sm:$0xff] }
  0x68   : > { %776 = vmatmul.mubr.f32.gmra.mrb[16].mxu1 %v391_v48  ;;  %2213 = vmatprep.subr.bf16.mxu1 %v2384_v3  ;;  %v2156_v1 = vpack.c.bf16 %v644_v60, %v643_v50  ;;  %v462_v48 = vld [vmem:[%s2528_s21 + $0x3f8] sm:$0xff]  ;;  %v485_v50 = vld [vmem:[%s2528_s21 + $0x4b0] sm:$0xff] }
  0x69   : > { %1001 = vmatmul.mubr.f32.gmra.mrb[16].mxu0 %v393_v49  ;;  %780 = vmatprep.mubr.f32.mxu1 %v399_v51  ;;  %v464_v49 = vld [vmem:[%s2528_s21 + $0x408] sm:$0xff]  ;;  %v463_v51 = vld [vmem:[%s2528_s21 + $0x400] sm:$0xff]  ;;  %v482_v60 = vld [vmem:[%s2528_s21 + $0x498] sm:$0xff] }
  0x6a   : > { %1005 = vmatprep.mubr.f32.mxu0 %v401_v53  ;;  %2151 = vmatpush1.bf16.msra.mxu0 %v2150_v52  ;;  %v469_v52 = vld [vmem:[%s2528_s21 + $0x430] sm:$0xff]  ;;  %v471_v53 = vld [vmem:[%s2528_s21 + $0x440] sm:$0xff] }
  0x6b   : > { %2152 = vmatprep.subr.bf16.mxu0 %v2384_v3  ;;  %2229 = vmatpush1.bf16.msra.mxu1 %v2585_v56  ;;  %v645_v56 = vld [vmem:[%s3343_s1 + $0x2b0] sm:$0xff] }
  0x6c   : > { %781 = vmatmul.mubr.f32.gmra.mrb[18].mxu1 %v398_v55  ;;  %2214 = vmatprep.subr.bf16.mxu1 %v2384_v3  ;;  %v2159_v9 = vpack.c.bf16 %v646_v4, %v645_v56  ;;  %v476_v55 = vld [vmem:[%s2528_s21 + $0x468] sm:$0xff]  ;;  %v497_v56 = vld [vmem:[%s2528_s21 + $0x510] sm:$0xff]  ;;  %v499_v4 = vld [vmem:[%s2528_s21 + $0x520] sm:$0xff] }
  0x6d   : > { %1006 = vmatmul.mubr.f32.gmra.mrb[18].mxu0 %v400_v57  ;;  %785 = vmatprep.mubr.f32.mxu1 %v406_v58  ;;  %v478_v57 = vld [vmem:[%s2528_s21 + $0x478] sm:$0xff]  ;;  %v475_v58 = vld [vmem:[%s2528_s21 + $0x460] sm:$0xff] }
  0x6e   : > { %1010 = vmatprep.mubr.f32.mxu0 %v408_v8  ;;  %2154 = vmatpush1.bf16.msra.mxu0 %v2153_v59  ;;  %v477_v59 = vld [vmem:[%s2528_s21 + $0x470] sm:$0xff]  ;;  %v483_v8 = vld [vmem:[%s2528_s21 + $0x4a0] sm:$0xff] }
  0x6f   : > { %2155 = vmatprep.subr.bf16.mxu0 %v2384_v3  ;;  %2230 = vmatpush1.bf16.msra.mxu1 %v2602_v62  ;;  %v647_v62 = vld [vmem:[%s3343_s1 + $0x2c0] sm:$0xff] }
  0x70   : > { %786 = vmatmul.mubr.f32.gmra.mrb[20].mxu1 %v405_v61  ;;  %2215 = vmatprep.subr.bf16.mxu1 %v2384_v3  ;;  %v2162_v16 = vpack.c.bf16 %v648_v11, %v647_v62  ;;  %v484_v61 = vld [vmem:[%s2528_s21 + $0x4a8] sm:$0xff]  ;;  %v339_v62 = vld [vmem:[%s2528_s21 + $0x20] sm:$0xff] }
  0x71   : > { %1011 = vmatmul.mubr.f32.gmra.mrb[20].mxu0 %v407_v63  ;;  %790 = vmatprep.mubr.f32.mxu1 %v413_v0  ;;  %v490_v63 = vld [vmem:[%s2528_s21 + $0x4d8] sm:$0xff]  ;;  %v492_v0 = vld [vmem:[%s2528_s21 + $0x4e8] sm:$0xff]  ;;  %v511_v11 = vld [vmem:[%s2528_s21 + $0x580] sm:$0xff] }
  0x72   : > { %1015 = vmatprep.mubr.f32.mxu0 %v415_v2  ;;  %2157 = vmatpush1.bf16.msra.mxu0 %v2156_v1  ;;  %v489_v1 = vld [vmem:[%s2528_s21 + $0x4d0] sm:$0xff]  ;;  %v491_v2 = vld [vmem:[%s2528_s21 + $0x4e0] sm:$0xff] }
  0x73   : > { %2158 = vmatprep.subr.bf16.mxu0 %v2384_v3  ;;  %2231 = vmatpush1.bf16.msra.mxu1 %v2619_v5  ;;  %v649_v5 = vld [vmem:[%s3343_s1 + $0x2d0] sm:$0xff] }
  0x74   : > { %791 = vmatmul.mubr.f32.gmra.mrb[22].mxu1 %v412_v6  ;;  %2216 = vmatprep.subr.bf16.mxu1 %v2384_v3  ;;  %v2165_v25 = vpack.c.bf16 %v650_v19, %v649_v5  ;;  %v496_v6 = vld [vmem:[%s2528_s21 + $0x508] sm:$0xff]  ;;  %v517_v5 = vld [vmem:[%s2528_s21 + $0x5b0] sm:$0xff] }
  0x75   : > { %1016 = vmatmul.mubr.f32.gmra.mrb[22].mxu0 %v414_v12  ;;  %795 = vmatprep.mubr.f32.mxu1 %v420_v7  ;;  %v498_v12 = vld [vmem:[%s2528_s21 + $0x518] sm:$0xff]  ;;  %v504_v7 = vld [vmem:[%s2528_s21 + $0x548] sm:$0xff]  ;;  %v353_v19 = vld [vmem:[%s2528_s21 + $0x90] sm:$0xff] }
  0x76   : > { %1020 = vmatprep.mubr.f32.mxu0 %v422_v10  ;;  %2160 = vmatpush1.bf16.msra.mxu0 %v2159_v9  ;;  %v340_v9 = vld [vmem:[%s2528_s21 + $0x28] sm:$0xff]  ;;  %v503_v10 = vld [vmem:[%s2528_s21 + $0x540] sm:$0xff] }
  0x77   : > { %2161 = vmatprep.subr.bf16.mxu0 %v2384_v3  ;;  %2232 = vmatpush1.bf16.msra.mxu1 %v2636_v13  ;;  %v651_v13 = vld [vmem:[%s3343_s1 + $0x2e0] sm:$0xff] }
  0x78   : > { %796 = vmatmul.mubr.f32.gmra.mrb[24].mxu1 %v419_v14  ;;  %2217 = vmatprep.subr.bf16.mxu1 %v2384_v3  ;;  %v2168_v32 = vpack.c.bf16 %v652_v26, %v651_v13  ;;  %v347_v14 = vld [vmem:[%s2528_s21 + $0x60] sm:$0xff]  ;;  %v368_v13 = vld [vmem:[%s2528_s21 + $0x108] sm:$0xff] }
  0x79   : > { %1021 = vmatmul.mubr.f32.gmra.mrb[24].mxu0 %v421_v15  ;;  %800 = vmatprep.mubr.f32.mxu1 %v427_v18  ;;  %v510_v15 = vld [vmem:[%s2528_s21 + $0x578] sm:$0xff]  ;;  %v531_v26 = vld [vmem:[%s2528_s21 + $0x620] sm:$0xff] }
  0x7a   : > { %1025 = vmatprep.mubr.f32.mxu0 %v429_v17  ;;  %2163 = vmatpush1.bf16.msra.mxu0 %v2162_v16  ;;  %v346_v18 = vld [vmem:[%s2528_s21 + $0x58] sm:$0xff] }
  0x7b   : > { %2164 = vmatprep.subr.bf16.mxu0 %v2384_v3  ;;  %2233 = vmatpush1.bf16.msra.mxu1 %v2653_v20  ;;  %v653_v20 = vld [vmem:[%s3343_s1 + $0x2f0] sm:$0xff]  ;;  %v518_v16 = vld [vmem:[%s2528_s21 + $0x5b8] sm:$0xff] }
  0x7c   : > { %801 = vmatmul.mubr.f32.gmra.mrb[26].mxu1 %v426_v21  ;;  %2218 = vmatprep.subr.bf16.mxu1 %v2384_v3  ;;  %v2171_v40 = vpack.c.bf16 %v654_v30, %v653_v20  ;;  %v354_v17 = vld [vmem:[%s2528_s21 + $0x98] sm:$0xff]  ;;  %v525_v21 = vld [vmem:[%s2528_s21 + $0x5f0] sm:$0xff] }
  0x7d   : > { %1026 = vmatmul.mubr.f32.gmra.mrb[26].mxu0 %v428_v22  ;;  %805 = vmatprep.mubr.f32.mxu1 %v434_v23  ;;  %v361_v22 = vld [vmem:[%s2528_s21 + $0xd0] sm:$0xff]  ;;  %v524_v23 = vld [vmem:[%s2528_s21 + $0x5e8] sm:$0xff]  ;;  %v546_v20 = vld [vmem:[%s2528_s21 + $0x698] sm:$0xff] }
  0x7e   : > { %1030 = vmatprep.mubr.f32.mxu0 %v436_v24  ;;  %2166 = vmatpush1.bf16.msra.mxu0 %v2165_v25  ;;  %v360_v25 = vld [vmem:[%s2528_s21 + $0xc8] sm:$0xff]  ;;  %v382_v30 = vld [vmem:[%s2528_s21 + $0x178] sm:$0xff] }
  0x7f   : > { %2167 = vmatprep.subr.bf16.mxu0 %v2384_v3  ;;  %2234 = vmatpush1.bf16.msra.mxu1 %v2670_v27  ;;  %v448_v27 = vld [vmem:[%s2528_s21 + $0x388] sm:$0xff] }
  0x80   : > { %806 = vmatmul.mubr.f32.gmra.mrb[28].mxu1 %v433_v28  ;;  %2219 = vmatprep.subr.bf16.mxu1 %v2384_v3  ;;  %v532_v24 = vld [vmem:[%s2528_s21 + $0x628] sm:$0xff]  ;;  %v367_v28 = vld [vmem:[%s2528_s21 + $0x100] sm:$0xff] }
  0x81   : > { %1031 = vmatmul.mubr.f32.gmra.mrb[28].mxu0 %v435_v29  ;;  %810 = vmatprep.mubr.f32.mxu1 %v441_v31  ;;  %v539_v29 = vld [vmem:[%s2528_s21 + $0x660] sm:$0xff] }
  0x82   : > { %1035 = vmatprep.mubr.f32.mxu0 %v443_v33  ;;  %2169 = vmatpush1.bf16.msra.mxu0 %v2168_v32  ;;  %v375_v31 = vld [vmem:[%s2528_s21 + $0x140] sm:$0xff]  ;;  %v538_v32 = vld [vmem:[%s2528_s21 + $0x658] sm:$0xff] }
  0x83   : > { %2170 = vmatprep.subr.bf16.mxu0 %v2384_v3  ;;  %2235 = vmatpush1.bf16.msra.mxu1 %v2687_v34  ;;  %v456_v34 = vld [vmem:[%s2528_s21 + $0x3c8] sm:$0xff]  ;;  %v374_v33 = vld [vmem:[%s2528_s21 + $0x138] sm:$0xff] }
  0x84   : > { %811 = vmatmul.mubr.f32.gmra.mrb[30].mxu1 %v440_v35  ;;  %2220 = vmatprep.subr.bf16.mxu1 %v2384_v3  ;;  %v454_v3 = vld [vmem:[%s2528_s21 + $0x3b8] sm:$0xff]  ;;  %v545_v35 = vld [vmem:[%s2528_s21 + $0x690] sm:$0xff] }
  0x85   : > { %1036 = vmatmul.mubr.f32.gmra.mrb[30].mxu0 %v442_v39  ;;  %815 = vmatprep.mubr.f32.mxu1 %v448_v27  ;;  %v389_v39 = vld [vmem:[%s2528_s21 + $0x1b0] sm:$0xff]  ;;  %v552_v27 = vld [vmem:[%s2528_s21 + $0x6c8] sm:$0xff] }
  0x86   : > { %1040 = vmatprep.mubr.f32.mxu0 %v450_v42  ;;  %2172 = vmatpush1.bf16.msra.mxu0 %v2171_v40  ;;  %v388_v40 = vld [vmem:[%s2528_s21 + $0x1a8] sm:$0xff]  ;;  %v506_v42 = vld [vmem:[%s2528_s21 + $0x558] sm:$0xff] }
  0x87   : > { %2236 = vmatpush1.bf16.msra.mxu1 %v2704_v41  ;;  %v461_v41 = vld [vmem:[%s2528_s21 + $0x3f0] sm:$0xff] }
  0x88   : > { %816 = vmatmul.mubr.f32.gmra.mrb[32].mxu1 %v447_v43  ;;  %2174 = vmatprep.subr.bf16.mxu1 %v2921_v36  ;;  %v396_v43 = vld [vmem:[%s2528_s21 + $0x1e8] sm:$0xff] }
  0x89   : > { %1041 = vmatmul.mubr.f32.gmra.mrb[32].mxu0 %v449_v45  ;;  %820 = vmatprep.mubr.f32.mxu1 %v455_v46  ;;  %v657_v45 = vld [vmem:[%s3343_s1 + $0x310] sm:$0xff]  ;;  %v658_v46 = vld [vmem:[%s3343_s1 + $0x318] sm:$0xff] }
  0x8a   : > { %1045 = vmatprep.mubr.f32.mxu0 %v457_v47  ;;  %v505_v47 = vld [vmem:[%s2528_s21 + $0x550] sm:$0xff] }
  0x8c   : > { %821 = vmatmul.mubr.f32.gmra.mrb[34].mxu1 %v454_v3  ;;  %v395_v3 = vld [vmem:[%s2528_s21 + $0x1e0] sm:$0xff] }
  0x8d   : > { %1046 = vmatmul.mubr.f32.gmra.mrb[34].mxu0 %v456_v34  ;;  %825 = vmatprep.mubr.f32.mxu1 %v462_v48  ;;  %v513_v34 = vld [vmem:[%s2528_s21 + $0x590] sm:$0xff]  ;;  %v403_v48 = vld [vmem:[%s2528_s21 + $0x220] sm:$0xff] }
  0x8e   : > { %1050 = vmatprep.mubr.f32.mxu0 %v464_v49  ;;  %v2177_v49 = vpack.c.bf16 %v658_v46, %v657_v45  ;;  %v473_v45 = vld [vmem:[%s2528_s21 + $0x450] sm:$0xff]  ;;  %v390_v46 = vld [vmem:[%s2528_s21 + $0x1b8] sm:$0xff] }
  0x90   : > { %826 = vmatmul.mubr.f32.gmra.mrb[36].mxu1 %v461_v41  ;;  %v659_v41 = vld [vmem:[%s3343_s1 + $0x320] sm:$0xff] }
  0x91   : > { %1051 = vmatmul.mubr.f32.gmra.mrb[36].mxu0 %v463_v51  ;;  %830 = vmatprep.mubr.f32.mxu1 %v469_v52  ;;  %v660_v51 = vld [vmem:[%s3343_s1 + $0x328] sm:$0xff] }
  0x92   : > { %1055 = vmatprep.mubr.f32.mxu0 %v471_v53  ;;  %v512_v52 = vld [vmem:[%s2528_s21 + $0x588] sm:$0xff]  ;;  %v402_v53 = vld [vmem:[%s2528_s21 + $0x218] sm:$0xff] }
  0x94   : > { %831 = vmatmul.mubr.f32.gmra.mrb[38].mxu1 %v468_v44  ;;  %v520_v44 = vld [vmem:[%s2528_s21 + $0x5c8] sm:$0xff] }
  0x95   : > { %1056 = vmatmul.mubr.f32.gmra.mrb[38].mxu0 %v470_v54  ;;  %835 = vmatprep.mubr.f32.mxu1 %v476_v55  ;;  %v410_v54 = vld [vmem:[%s2528_s21 + $0x258] sm:$0xff]  ;;  %v2181_v55 = vpack.c.bf16 %v660_v51, %v659_v41  ;;  %v411_v41 = vld [vmem:[%s2528_s21 + $0x260] sm:$0xff] }
  0x96   : > { %1060 = vmatprep.mubr.f32.mxu0 %v478_v57  ;;  %v661_v57 = vld [vmem:[%s3343_s1 + $0x330] sm:$0xff]  ;;  %v487_v51 = vld [vmem:[%s2528_s21 + $0x4c0] sm:$0xff] }
  0x98   : > { %836 = vmatmul.mubr.f32.gmra.mrb[40].mxu1 %v475_v58  ;;  %v519_v58 = vld [vmem:[%s2528_s21 + $0x5c0] sm:$0xff] }
  0x99   : > { %1061 = vmatmul.mubr.f32.gmra.mrb[40].mxu0 %v477_v59  ;;  %840 = vmatprep.mubr.f32.mxu1 %v483_v8  ;;  %v409_v59 = vld [vmem:[%s2528_s21 + $0x250] sm:$0xff]  ;;  %v527_v8 = vld [vmem:[%s2528_s21 + $0x600] sm:$0xff] }
  0x9a   : > { %1065 = vmatprep.mubr.f32.mxu0 %v485_v50  ;;  %v417_v50 = vld [vmem:[%s2528_s21 + $0x290] sm:$0xff] }
  0x9c   : > { %841 = vmatmul.mubr.f32.gmra.mrb[42].mxu1 %v482_v60 }
  0x9d   : > { %1066 = vmatmul.mubr.f32.gmra.mrb[42].mxu0 %v484_v61  ;;  %845 = vmatprep.mubr.f32.mxu1 %v490_v63  ;;  %v663_v61 = vld [vmem:[%s3343_s1 + $0x340] sm:$0xff]  ;;  %v664_v63 = vld [vmem:[%s3343_s1 + $0x348] sm:$0xff] }
  0x9e   : > { %1070 = vmatprep.mubr.f32.mxu0 %v492_v0  ;;  %v526_v0 = vld [vmem:[%s2528_s21 + $0x5f8] sm:$0xff] }
  0xa0   : > { %846 = vmatmul.mubr.f32.gmra.mrb[44].mxu1 %v489_v1  ;;  %v416_v1 = vld [vmem:[%s2528_s21 + $0x288] sm:$0xff] }
  0xa1   : > { %1071 = vmatmul.mubr.f32.gmra.mrb[44].mxu0 %v491_v2  ;;  %850 = vmatprep.mubr.f32.mxu1 %v497_v56  ;;  %v534_v2 = vld [vmem:[%s2528_s21 + $0x638] sm:$0xff]  ;;  %v424_v56 = vld [vmem:[%s2528_s21 + $0x2c8] sm:$0xff] }
  0xa2   : > { %1075 = vmatprep.mubr.f32.mxu0 %v499_v4  ;;  %v2189_v4 = vpack.c.bf16 %v664_v63, %v663_v61  ;;  %v460_v61 = vld [vmem:[%s2528_s21 + $0x3e8] sm:$0xff]  ;;  %v507_v63 = vld [vmem:[%s2528_s21 + $0x560] sm:$0xff] }
  0xa4   : > { %851 = vmatmul.mubr.f32.gmra.mrb[46].mxu1 %v496_v6  ;;  %v665_v6 = vld [vmem:[%s3343_s1 + $0x350] sm:$0xff] }
  0xa5   : > { %1076 = vmatmul.mubr.f32.gmra.mrb[46].mxu0 %v498_v12  ;;  %855 = vmatprep.mubr.f32.mxu1 %v504_v7  ;;  %v666_v12 = vld [vmem:[%s3343_s1 + $0x358] sm:$0xff]  ;;  %v533_v7 = vld [vmem:[%s2528_s21 + $0x630] sm:$0xff] }
  0xa6   : > { %1185 = vmatprep.mubr.f32.mxu0 %v340_v9  ;;  %v423_v9 = vld [vmem:[%s2528_s21 + $0x2c0] sm:$0xff] }
  0xa8   : > { %856 = vmatmul.mubr.f32.gmra.mrb[48].mxu1 %v503_v10  ;;  %v541_v10 = vld [vmem:[%s2528_s21 + $0x670] sm:$0xff] }
  0xa9   : > { %1186 = vmatmul.mubr.f32.vlgmr.msra.gmra.mrb[0].mxu0 %v339_v62  ;;  %860 = vmatprep.mubr.f32.mxu1 %v511_v11  ;;  %v431_v62 = vld [vmem:[%s2528_s21 + $0x300] sm:$0xff]  ;;  %v2193_v11 = vpack.c.bf16 %v666_v12, %v665_v6  ;;  %v522_v6 = vld [vmem:[%s2528_s21 + $0x5d8] sm:$0xff]  ;;  %v488_v12 = vld [vmem:[%s2528_s21 + $0x4c8] sm:$0xff] }
  0xaa   : > { %1190 = vmatprep.mubr.f32.mxu0 %v347_v14  ;;  %v667_v14 = vld [vmem:[%s3343_s1 + $0x360] sm:$0xff] }
  0xac   : > { %861 = vmatmul.mubr.f32.gmra.mrb[50].mxu1 %v510_v15  ;;  %v668_v15 = vld [vmem:[%s3343_s1 + $0x368] sm:$0xff] }
  0xad   : > { %1191 = vmatmul.mubr.f32.gmra.mrb[2].mxu0 %v346_v18  ;;  %865 = vmatprep.mubr.f32.mxu1 %v518_v16  ;;  %v540_v18 = vld [vmem:[%s2528_s21 + $0x668] sm:$0xff]  ;;  %v430_v16 = vld [vmem:[%s2528_s21 + $0x2f8] sm:$0xff] }
  0xae   : > { %1195 = vmatprep.mubr.f32.mxu0 %v354_v17  ;;  %v548_v17 = vld [vmem:[%s2528_s21 + $0x6a8] sm:$0xff] }
  0xb0   : > { %866 = vmatmul.mubr.f32.gmra.mrb[52].mxu1 %v517_v5  ;;  %v438_v5 = vld [vmem:[%s2528_s21 + $0x338] sm:$0xff] }
  0xb1   : > { %1196 = vmatmul.mubr.f32.gmra.mrb[4].mxu0 %v353_v19  ;;  %870 = vmatprep.mubr.f32.mxu1 %v525_v21  ;;  %v2197_v19 = vpack.c.bf16 %v668_v15, %v667_v14  ;;  %v669_v21 = vld [vmem:[%s3343_s1 + $0x370] sm:$0xff]  ;;  %v536_v15 = vld [vmem:[%s2528_s21 + $0x648] sm:$0xff] }
  0xb2   : > { %1200 = vmatprep.mubr.f32.mxu0 %v361_v22  ;;  %v670_v22 = vld [vmem:[%s3343_s1 + $0x378] sm:$0xff]  ;;  %v509_v14 = vld [vmem:[%s2528_s21 + $0x570] sm:$0xff] }
  0xb4   : > { %871 = vmatmul.mubr.f32.gmra.mrb[54].mxu1 %v524_v23  ;;  %v547_v23 = vld [vmem:[%s2528_s21 + $0x6a0] sm:$0xff] }
  0xb5   : > { %1201 = vmatmul.mubr.f32.gmra.mrb[6].mxu0 %v360_v25  ;;  %875 = vmatprep.mubr.f32.mxu1 %v532_v24  ;;  %v437_v25 = vld [vmem:[%s2528_s21 + $0x330] sm:$0xff]  ;;  %v555_v24 = vld [vmem:[%s2528_s21 + $0x6e0] sm:$0xff] }
  0xb6   : > { %1205 = vmatprep.mubr.f32.mxu0 %v368_v13  ;;  %v445_v13 = vld [vmem:[%s2528_s21 + $0x370] sm:$0xff] }
  0xb8   : > { %876 = vmatmul.mubr.f32.gmra.mrb[56].mxu1 %v531_v26  ;;  %v2201_v26 = vpack.c.bf16 %v670_v22, %v669_v21  ;;  %v542_v21 = vld [vmem:[%s2528_s21 + $0x678] sm:$0xff]  ;;  %v537_v22 = vld [vmem:[%s2528_s21 + $0x650] sm:$0xff] }
  0xb9   : > { %1206 = vmatmul.mubr.f32.gmra.mrb[8].mxu0 %v367_v28  ;;  %880 = vmatprep.mubr.f32.mxu1 %v539_v29  ;;  %v554_v28 = vld [vmem:[%s2528_s21 + $0x6d8] sm:$0xff]  ;;  %v444_v29 = vld [vmem:[%s2528_s21 + $0x368] sm:$0xff] }
  0xba   : > { %1210 = vmatprep.mubr.f32.mxu0 %v375_v31  ;;  %v452_v31 = vld [vmem:[%s2528_s21 + $0x3a8] sm:$0xff] }
  0xbc   : > { %881 = vmatmul.mubr.f32.gmra.mrb[58].mxu1 %v538_v32  ;;  %v341_v32 = vld [vmem:[%s2528_s21 + $0x30] sm:$0xff] }
  0xbd   : > { %1211 = vmatmul.mubr.f32.gmra.mrb[10].mxu0 %v374_v33  ;;  %885 = vmatprep.mubr.f32.mxu1 %v546_v20  ;;  %v348_v33 = vld [vmem:[%s2528_s21 + $0x68] sm:$0xff]  ;;  %v451_v20 = vld [vmem:[%s2528_s21 + $0x3a0] sm:$0xff] }
  0xbe   : > { %1215 = vmatprep.mubr.f32.mxu0 %v382_v30  ;;  %v355_v30 = vld [vmem:[%s2528_s21 + $0xa0] sm:$0xff] }
  0xc0   : > { %886 = vmatmul.mubr.f32.gmra.mrb[60].mxu1 %v545_v35  ;;  %v459_v35 = vld [vmem:[%s2528_s21 + $0x3e0] sm:$0xff] }
  0xc1   : > { %1216 = vmatmul.mubr.f32.gmra.mrb[12].mxu0 %v381_v37  ;;  %890 = vmatprep.mubr.f32.mxu1 %v553_v38  ;;  %v362_v37 = vld [vmem:[%s2528_s21 + $0xd8] sm:$0xff] }
  0xc2   : > { %1220 = vmatprep.mubr.f32.mxu0 %v389_v39  ;;  %v458_v38 = vld [vmem:[%s2528_s21 + $0x3d8] sm:$0xff]  ;;  %v369_v39 = vld [vmem:[%s2528_s21 + $0x110] sm:$0xff] }
  0xc4   : > { %891 = vmatmul.mubr.f32.gmra.mrb[62].mxu1 %v552_v27  ;;  %v466_v27 = vld [vmem:[%s2528_s21 + $0x418] sm:$0xff] }
  0xc5   : > { %1221 = vmatmul.mubr.f32.gmra.mrb[14].mxu0 %v388_v40  ;;  %1080 = vmatprep.mubr.f32.mxu1 %v506_v42  ;;  %v376_v40 = vld [vmem:[%s2528_s21 + $0x148] sm:$0xff]  ;;  %v465_v42 = vld [vmem:[%s2528_s21 + $0x410] sm:$0xff] }
  0xc6   : > { %1225 = vmatprep.mubr.f32.mxu0 %v396_v43  ;;  %v383_v43 = vld [vmem:[%s2528_s21 + $0x180] sm:$0xff] }
  0xc8   : > { %1081 = vmatmul.mubr.f32.vlgmr.msra.gmra.mrb[48].mxu1 %v505_v47  ;;  %v472_v47 = vld [vmem:[%s2528_s21 + $0x448] sm:$0xff] }
  0xc9   : > { %1226 = vmatmul.mubr.f32.gmra.mrb[16].mxu0 %v395_v3  ;;  %2176 = vmatpush3.bf16.msra.mxu1 %v2921_v36  ;;  %v662_v36 = vld [vmem:[%s3343_s1 + $0x338] sm:$0xff]  ;;  %v397_v3 = vld [vmem:[%s2528_s21 + $0x1f0] sm:$0xff] }
  0xca   : > { %1085 = vmatprep.mubr.f32.mxu1 %v513_v34  ;;  %1230 = vmatprep.mubr.f32.mxu0 %v403_v48  ;;  %v2185_v60 = vpack.c.bf16 %v662_v36, %v661_v57  ;;  %v480_v34 = vld [vmem:[%s2528_s21 + $0x488] sm:$0xff]  ;;  %v493_v57 = vld [vmem:[%s2528_s21 + $0x4f0] sm:$0xff]  ;;  %v439_v36 = vld [vmem:[%s2528_s21 + $0x340] sm:$0xff] }
  0xcb   : > { %2178 = vmatprep.subr.bf16.mxu1 %v2177_v49  ;;  %v404_v48 = vld [vmem:[%s2528_s21 + $0x228] sm:$0xff] }
  0xcc   : > { %1086 = vmatmul.mubr.f32.gmra.mrb[50].mxu1 %v512_v52  ;;  %v418_v52 = vld [vmem:[%s2528_s21 + $0x298] sm:$0xff] }
  0xcd   : > { %1231 = vmatmul.mubr.f32.gmra.mrb[18].mxu0 %v402_v53  ;;  %2180 = vmatpush3.bf16.msra.mxu1 %v2177_v49  ;;  %v479_v49 = vld [vmem:[%s2528_s21 + $0x480] sm:$0xff]  ;;  %v486_v53 = vld [vmem:[%s2528_s21 + $0x4b8] sm:$0xff] }
  0xce   : > { %1090 = vmatprep.mubr.f32.mxu1 %v520_v44  ;;  %1235 = vmatprep.mubr.f32.mxu0 %v410_v54  ;;  %v425_v44 = vld [vmem:[%s2528_s21 + $0x2d0] sm:$0xff]  ;;  %v494_v54 = vld [vmem:[%s2528_s21 + $0x4f8] sm:$0xff] }
  0xcf   : > { %2182 = vmatprep.subr.bf16.mxu1 %v2181_v55 }
  0xd0   : > { %1091 = vmatmul.mubr.f32.gmra.mrb[52].mxu1 %v519_v58  ;;  %v501_v58 = vld [vmem:[%s2528_s21 + $0x530] sm:$0xff] }
  0xd1   : > { %1236 = vmatmul.mubr.f32.gmra.mrb[20].mxu0 %v409_v59  ;;  %2184 = vmatpush3.bf16.msra.mxu1 %v2181_v55  ;;  %v432_v55 = vld [vmem:[%s2528_s21 + $0x308] sm:$0xff]  ;;  %v446_v59 = vld [vmem:[%s2528_s21 + $0x378] sm:$0xff] }
  0xd2   : > { %1095 = vmatprep.mubr.f32.mxu1 %v527_v8  ;;  %1240 = vmatprep.mubr.f32.mxu0 %v417_v50  ;;  %v500_v8 = vld [vmem:[%s2528_s21 + $0x528] sm:$0xff]  ;;  %v453_v50 = vld [vmem:[%s2528_s21 + $0x3b0] sm:$0xff] }
  0xd3   : > { %2186 = vmatprep.subr.bf16.mxu1 %v2185_v60 }
  0xd4   : > { %1096 = vmatmul.mubr.f32.gmra.mrb[54].mxu1 %v526_v0  ;;  %v467_v0 = vld [vmem:[%s2528_s21 + $0x420] sm:$0xff] }
  0xd5   : > { %1241 = vmatmul.mubr.f32.gmra.mrb[22].mxu0 %v416_v1  ;;  %2188 = vmatpush3.bf16.msra.mxu1 %v2185_v60  ;;  %v508_v60 = vld [vmem:[%s2528_s21 + $0x568] sm:$0xff]  ;;  %v515_v1 = vld [vmem:[%s2528_s21 + $0x5a0] sm:$0xff] }
  0xd6   : > { %1100 = vmatprep.mubr.f32.mxu1 %v534_v2  ;;  %1245 = vmatprep.mubr.f32.mxu0 %v424_v56  ;;  %v474_v2 = vld [vmem:[%s2528_s21 + $0x458] sm:$0xff] }
  0xd7   : > { %2190 = vmatprep.subr.bf16.mxu1 %v2189_v4  ;;  %v514_v56 = vld [vmem:[%s2528_s21 + $0x598] sm:$0xff] }
  0xd8   : > { %1101 = vmatmul.mubr.f32.gmra.mrb[56].mxu1 %v533_v7  ;;  %v521_v7 = vld [vmem:[%s2528_s21 + $0x5d0] sm:$0xff] }
  0xd9   : > { %1246 = vmatmul.mubr.f32.gmra.mrb[24].mxu0 %v423_v9  ;;  %2192 = vmatpush3.bf16.msra.mxu1 %v2189_v4  ;;  %v481_v4 = vld [vmem:[%s2528_s21 + $0x490] sm:$0xff]  ;;  %v495_v9 = vld [vmem:[%s2528_s21 + $0x500] sm:$0xff] }
  0xda   : > { %1105 = vmatprep.mubr.f32.mxu1 %v541_v10  ;;  %1250 = vmatprep.mubr.f32.mxu0 %v431_v62  ;;  %v529_v10 = vld [vmem:[%s2528_s21 + $0x610] sm:$0xff]  ;;  %v502_v62 = vld [vmem:[%s2528_s21 + $0x538] sm:$0xff] }
  0xdb   : > { %2194 = vmatprep.subr.bf16.mxu1 %v2193_v11 }
  0xdc   : > { %1106 = vmatmul.mubr.f32.gmra.mrb[58].mxu1 %v540_v18  ;;  %v516_v18 = vld [vmem:[%s2528_s21 + $0x5a8] sm:$0xff] }
  0xdd   : > { %1251 = vmatmul.mubr.f32.gmra.mrb[26].mxu0 %v430_v16  ;;  %2196 = vmatpush3.bf16.msra.mxu1 %v2193_v11  ;;  %v528_v11 = vld [vmem:[%s2528_s21 + $0x608] sm:$0xff]  ;;  %v535_v16 = vld [vmem:[%s2528_s21 + $0x640] sm:$0xff] }
  0xde   : > { %1110 = vmatprep.mubr.f32.mxu1 %v548_v17  ;;  %1255 = vmatprep.mubr.f32.mxu0 %v438_v5  ;;  %v523_v17 = vld [vmem:[%s2528_s21 + $0x5e0] sm:$0xff] }
  0xdf   : > { %2198 = vmatprep.subr.bf16.mxu1 %v2197_v19  ;;  %v543_v5 = vld [vmem:[%s2528_s21 + $0x680] sm:$0xff] }
  0xe0   : > { %1111 = vmatmul.mubr.f32.gmra.mrb[60].mxu1 %v547_v23 }
  0xe1   : > { %1256 = vmatmul.mubr.f32.gmra.mrb[28].mxu0 %v437_v25  ;;  %2200 = vmatpush3.bf16.msra.mxu1 %v2197_v19  ;;  %v530_v19 = vld [vmem:[%s2528_s21 + $0x618] sm:$0xff] }
  0xe2   : > { %1115 = vmatprep.mubr.f32.mxu1 %v555_v24  ;;  %1260 = vmatprep.mubr.f32.mxu0 %v445_v13  ;;  %v550_v25 = vld [vmem:[%s2528_s21 + $0x6b8] sm:$0xff]  ;;  %v544_v13 = vld [vmem:[%s2528_s21 + $0x688] sm:$0xff] }
  0xe3   : > { %2202 = vmatprep.subr.bf16.mxu1 %v2201_v26 }
  0xe4   : > { %1116 = vmatmul.mubr.f32.gmra.mrb[62].mxu1 %v554_v28  ;;  %v551_v28 = vld [vmem:[%s2528_s21 + $0x6c0] sm:$0xff] }
  0xe5   : > { %1261 = vmatmul.mubr.f32.gmra.mrb[30].mxu0 %v444_v29  ;;  %2204 = vmatpush3.bf16.msra.mxu1 %v2201_v26  ;;  %v549_v26 = vld [vmem:[%s2528_s21 + $0x6b0] sm:$0xff] }
  0xe6   : > { %1265 = vmatprep.mubr.f32.mxu0 %v452_v31  ;;  %1981 = vmatprep.mubr.f32.mxu1 %v341_v32  ;;  %v557_v31 = vld [vmem:[%s2528_s21 + $0x6f0] sm:$0xff] }
  0xe8   : > { %1982 = vmatmul.mubr.f32.vlgmr.msra.gmra.mrb[64].mxu1 %v348_v33  ;;  %v558_v33 = vld [vmem:[%s2528_s21 + $0x6f8] sm:$0xff] }
  0xe9   : > { %1266 = vmatmul.mubr.f32.gmra.mrb[32].mxu0 %v451_v20  ;;  %1984 = vmatprep.mubr.f32.mxu1 %v355_v30  ;;  %v556_v20 = vld [vmem:[%s2528_s21 + $0x6e8] sm:$0xff] }
  0xea   : > { %1270 = vmatprep.mubr.f32.mxu0 %v459_v35 }
  0xec   : > { %1985 = vmatmul.mubr.f32.gmra.mrb[66].mxu1 %v362_v37 }
  0xed   : > { %1271 = vmatmul.mubr.f32.gmra.mrb[34].mxu0 %v458_v38  ;;  %1987 = vmatprep.mubr.f32.mxu1 %v369_v39 }
  0xee   : > { %1275 = vmatprep.mubr.f32.mxu0 %v466_v27 }
  0xf0   : > { %1988 = vmatmul.mubr.f32.gmra.mrb[68].mxu1 %v376_v40 }
  0xf1   : > { %1276 = vmatmul.mubr.f32.gmra.mrb[36].mxu0 %v465_v42  ;;  %1990 = vmatprep.mubr.f32.mxu1 %v383_v43 }
  0xf2   : > { %1280 = vmatprep.mubr.f32.mxu0 %v473_v45 }
  0xf4   : > { %1991 = vmatmul.mubr.f32.gmra.mrb[70].mxu1 %v390_v46 }
  0xf5   : > { %1281 = vmatmul.mubr.f32.gmra.mrb[38].mxu0 %v472_v47  ;;  %1993 = vmatprep.mubr.f32.mxu1 %v397_v3 }
  0xf6   : > { %1285 = vmatprep.mubr.f32.mxu0 %v480_v34 }
  0xf8   : > { %1994 = vmatmul.mubr.f32.gmra.mrb[72].mxu1 %v404_v48 }
  0xf9   : > { %1286 = vmatmul.mubr.f32.gmra.mrb[40].mxu0 %v479_v49  ;;  %1996 = vmatprep.mubr.f32.mxu1 %v411_v41 }
  0xfa   : > { %1290 = vmatprep.mubr.f32.mxu0 %v487_v51 }
  0xfc   : > { %1997 = vmatmul.mubr.f32.gmra.mrb[74].mxu1 %v418_v52 }
  0xfd   : > { %1291 = vmatmul.mubr.f32.gmra.mrb[42].mxu0 %v486_v53  ;;  %1999 = vmatprep.mubr.f32.mxu1 %v425_v44 }
  0xfe   : > { %1295 = vmatprep.mubr.f32.mxu0 %v494_v54 }
 0x100   : > { %2000 = vmatmul.mubr.f32.gmra.mrb[76].mxu1 %v432_v55 }
 0x101   : > { %1296 = vmatmul.mubr.f32.gmra.mrb[44].mxu0 %v493_v57  ;;  %2002 = vmatprep.mubr.f32.mxu1 %v439_v36 }
 0x102   : > { %1300 = vmatprep.mubr.f32.mxu0 %v501_v58 }
 0x104   : > { %2003 = vmatmul.mubr.f32.gmra.mrb[78].mxu1 %v446_v59 }
 0x105   : > { %1301 = vmatmul.mubr.f32.gmra.mrb[46].mxu0 %v500_v8  ;;  %2005 = vmatprep.mubr.f32.mxu1 %v453_v50 }
 0x106   : > { %1305 = vmatprep.mubr.f32.mxu0 %v508_v60 }
 0x108   : > { %2006 = vmatmul.mubr.f32.gmra.mrb[80].mxu1 %v460_v61 }
 0x109   : > { %1306 = vmatmul.mubr.f32.gmra.mrb[48].mxu0 %v507_v63  ;;  %2008 = vmatprep.mubr.f32.mxu1 %v467_v0 }
 0x10a   : > { %1310 = vmatprep.mubr.f32.mxu0 %v515_v1 }
 0x10c   : > { %2009 = vmatmul.mubr.f32.gmra.mrb[82].mxu1 %v474_v2 }
 0x10d   : > { %1311 = vmatmul.mubr.f32.gmra.mrb[50].mxu0 %v514_v56  ;;  %2011 = vmatprep.mubr.f32.mxu1 %v481_v4 }
 0x10e   : > { %1315 = vmatprep.mubr.f32.mxu0 %v522_v6 }
 0x110   : > { %2012 = vmatmul.mubr.f32.gmra.mrb[84].mxu1 %v488_v12 }
 0x111   : > { %1316 = vmatmul.mubr.f32.gmra.mrb[52].mxu0 %v521_v7  ;;  %2014 = vmatprep.mubr.f32.mxu1 %v495_v9 }
 0x112   : > { %1320 = vmatprep.mubr.f32.mxu0 %v529_v10 }
 0x114   : > { %2015 = vmatmul.mubr.f32.gmra.mrb[86].mxu1 %v502_v62 }
 0x115   : > { %1321 = vmatmul.mubr.f32.gmra.mrb[54].mxu0 %v528_v11  ;;  %2017 = vmatprep.mubr.f32.mxu1 %v509_v14 }
 0x116   : > { %1325 = vmatprep.mubr.f32.mxu0 %v536_v15 }
 0x118   : > { %2018 = vmatmul.mubr.f32.gmra.mrb[88].mxu1 %v516_v18 }
 0x119   : > { %1326 = vmatmul.mubr.f32.gmra.mrb[56].mxu0 %v535_v16  ;;  %2020 = vmatprep.mubr.f32.mxu1 %v523_v17 }
 0x11a   : > { %1330 = vmatprep.mubr.f32.mxu0 %v543_v5 }
 0x11b   : > { %v3119_v23 = vpop.f32.mrb[0].mxu1 }
 0x11c   : > { %2021 = vmatmul.mubr.f32.gmra.mrb[90].mxu1 %v530_v19  ;;  %v739_v24 = vpop.f32.mrb[1].mxu1 }
 0x11d   : > { %1331 = vmatmul.mubr.f32.gmra.mrb[58].mxu0 %v542_v21  ;;  %2023 = vmatprep.mubr.f32.mxu1 %v537_v22 }
 0x11e   : > { %1335 = vmatprep.mubr.f32.mxu0 %v550_v25 }
 0x11f   : > { %v742_v29 = vpop.f32.mrb[2].mxu1 }
 0x120   : > { %2024 = vmatmul.mubr.f32.gmra.mrb[92].mxu1 %v544_v13  ;;  %v744_v32 = vpop.f32.mrb[3].mxu1 }
 0x121   : > { %1336 = vmatmul.mubr.f32.gmra.mrb[60].mxu0 %v549_v26  ;;  %2026 = vmatprep.mubr.f32.mxu1 %v551_v28 }
 0x122   : > { %1340 = vmatprep.mubr.f32.mxu0 %v557_v31 }
 0x123   : > { %v747_v30 = vpop.f32.mrb[4].mxu1 }
 0x124   : > { %2027 = vmatmul.mubr.f32.gmra.mrb[94].mxu1 %v558_v33  ;;  %v749_v35 = vpop.f32.mrb[5].mxu1 }
 0x125   : > { %1341 = vmatmul.mubr.f32.gmra.mrb[62].mxu0 %v556_v20 }
 0x127   : > { %v752_v37 = vpop.f32.mrb[6].mxu1 }
 0x128   : > { %v754_v38 = vpop.f32.mrb[7].mxu1 }
 0x12b   : > { %v757_v39 = vpop.f32.mrb[8].mxu1 }
 0x12c   : > { %v759_v27 = vpop.f32.mrb[9].mxu1 }
 0x12f   : > { %v762_v40 = vpop.f32.mrb[10].mxu1 }
 0x130   : > { %v764_v42 = vpop.f32.mrb[11].mxu1 }
 0x133   : > { %v767_v43 = vpop.f32.mrb[12].mxu1 }
 0x134   : > { %v769_v45 = vpop.f32.mrb[13].mxu1 }
 0x137   : > { %v772_v46 = vpop.f32.mrb[14].mxu1 }
 0x138   : > { %v774_v47 = vpop.f32.mrb[15].mxu1 }
 0x13b   : > { %v777_v3 = vpop.f32.mrb[16].mxu1 }
 0x13c   : > { %v779_v34 = vpop.f32.mrb[17].mxu1 }
 0x13f   : > { %v782_v48 = vpop.f32.mrb[18].mxu1 }
 0x140   : > { %v784_v49 = vpop.f32.mrb[19].mxu1 }
 0x143   : > { %v3128_v41 = vpop.f32.mrb[20].mxu1 }
 0x144   : > { %v789_v51 = vpop.f32.mrb[21].mxu1 }
 0x147   : > { %v3130_v52 = vpop.f32.mrb[22].mxu1 }
 0x148   : > { %v794_v53 = vpop.f32.mrb[23].mxu1 }
 0x14b   : > { %v3132_v44 = vpop.f32.mrb[24].mxu1 }
 0x14c   : > { %v799_v54 = vpop.f32.mrb[25].mxu1 }
 0x14f   : > { %v3134_v55 = vpop.f32.mrb[26].mxu1 }
 0x150   : > { %v804_v57 = vpop.f32.mrb[27].mxu1 }
 0x153   : > { %v3136_v36 = vpop.f32.mrb[28].mxu1 }
 0x154   : > { %v809_v58 = vpop.f32.mrb[29].mxu1 }
 0x157   : > { %v3138_v59 = vpop.f32.mrb[30].mxu1 }
 0x158   : > { %v814_v8 = vpop.f32.mrb[31].mxu1 }
 0x15b   : > { %v3140_v50 = vpop.f32.mrb[32].mxu1 }
 0x15c   : > { %v819_v60 = vpop.f32.mrb[33].mxu1 }
 0x15f   : > { %v3142_v61 = vpop.f32.mrb[34].mxu1 }
 0x160   : > { %v824_v63 = vpop.f32.mrb[35].mxu1 }
 0x163   : > { %v3144_v0 = vpop.f32.mrb[36].mxu1 }
 0x164   : > { %v829_v1 = vpop.f32.mrb[37].mxu1 }
 0x167   : > { %v3146_v2 = vpop.f32.mrb[38].mxu1 }
 0x168   : > { %v834_v56 = vpop.f32.mrb[39].mxu1 }
 0x16b   : > { %v3148_v4 = vpop.f32.mrb[40].mxu1 }
 0x16c   : > { %v839_v6 = vpop.f32.mrb[41].mxu1 }
 0x16f   : > { %v3150_v12 = vpop.f32.mrb[42].mxu1 }
 0x170   : > { %v844_v7 = vpop.f32.mrb[43].mxu1 }
 0x173   : > { %v3152_v9 = vpop.f32.mrb[44].mxu1 }
 0x174   : > { %v849_v10 = vpop.f32.mrb[45].mxu1 }
 0x177   : > { %v3154_v62 = vpop.f32.mrb[46].mxu1 }
 0x178   : > { %v854_v11 = vpop.f32.mrb[47].mxu1 }
 0x17c   : > { %v1187_v14 = vpop.f32.mrb[0].mxu0 }
 0x17d   : > { %v3157_v15 = vadd.f32 %v1187_v14, %v3119_v23  ;;  %v1189_v18 = vpop.f32.mrb[1].mxu0 }
 0x180   : > { %v1192_v16 = vpop.f32.mrb[2].mxu0 }
 0x181   : > { %v2238_v17 = vadd.f32 %v1192_v16, %v742_v29  ;;  %v1194_v5 = vpop.f32.mrb[3].mxu0 }
 0x184   : > { %v1197_v19 = vpop.f32.mrb[4].mxu0 }
 0x185   : > { %v3159_v21 = vadd.f32 %v1197_v19, %v747_v30  ;;  %v1199_v22 = vpop.f32.mrb[5].mxu0 }
 0x188   : > { %v1202_v25 = vpop.f32.mrb[6].mxu0 }
 0x189   : > { %v3161_v24 = vadd.f32 %v1202_v25, %v752_v37  ;;  %v1204_v13 = vpop.f32.mrb[7].mxu0 }
 0x18c   : > { %v1207_v26 = vpop.f32.mrb[8].mxu0 }
 0x18d   : > { %v3163_v28 = vadd.f32 %v1207_v26, %v757_v39  ;;  %v1209_v31 = vpop.f32.mrb[9].mxu0 }
 0x190   : > { %v1212_v32 = vpop.f32.mrb[10].mxu0 }
 0x191   : > { %v3165_v33 = vadd.f32 %v1212_v32, %v762_v40  ;;  %v1214_v23 = vpop.f32.mrb[11].mxu0 }
 0x194   : > { %v1217_v20 = vpop.f32.mrb[12].mxu0 }
 0x195   : > { %v3167_v35 = vadd.f32 %v1217_v20, %v767_v43  ;;  %v1219_v29 = vpop.f32.mrb[13].mxu0 }
 0x198   : > { %v1222_v38 = vpop.f32.mrb[14].mxu0 }
 0x199   : > { %v3169_v30 = vadd.f32 %v1222_v38, %v772_v46  ;;  %v1224_v27 = vpop.f32.mrb[15].mxu0 }
 0x19b   : > { %v3171_v42 = vpop.f32.mrb[48].mxu1 }
 0x19c   : > { %v1227_v37 = vpop.f32.mrb[16].mxu0  ;;  %v1084_v45 = vpop.f32.mrb[49].mxu1 }
 0x19d   : > { %v3173_v47 = vadd.f32 %v1227_v37, %v777_v3  ;;  %v1229_v39 = vpop.f32.mrb[17].mxu0 }
 0x19f   : > { %v3175_v34 = vpop.f32.mrb[50].mxu1 }
 0x1a0   : > { %v1232_v40 = vpop.f32.mrb[18].mxu0  ;;  %v1089_v49 = vpop.f32.mrb[51].mxu1 }
 0x1a1   : > { %v3177_v51 = vadd.f32 %v1232_v40, %v782_v48  ;;  %v1234_v43 = vpop.f32.mrb[19].mxu0 }
 0x1a3   : > { %v3179_v53 = vpop.f32.mrb[52].mxu1 }
 0x1a4   : > { %v1237_v54 = vpop.f32.mrb[20].mxu0  ;;  %v1094_v46 = vpop.f32.mrb[53].mxu1 }
 0x1a5   : > { %v3182_v57 = vadd.f32 %v1237_v54, %v3128_v41  ;;  %v1239_v58 = vpop.f32.mrb[21].mxu0 }
 0x1a7   : > { %v3184_v8 = vpop.f32.mrb[54].mxu1 }
 0x1a8   : > { %v1242_v3 = vpop.f32.mrb[22].mxu0  ;;  %v1099_v60 = vpop.f32.mrb[55].mxu1 }
 0x1a9   : > { %v3187_v63 = vadd.f32 %v1242_v3, %v3130_v52  ;;  %v1244_v1 = vpop.f32.mrb[23].mxu0 }
 0x1ab   : > { %v3189_v56 = vpop.f32.mrb[56].mxu1 }
 0x1ac   : > { %v1247_v48 = vpop.f32.mrb[24].mxu0  ;;  %v1104_v6 = vpop.f32.mrb[57].mxu1 }
 0x1ad   : > { %v3192_v7 = vadd.f32 %v1247_v48, %v3132_v44  ;;  %v1249_v10 = vpop.f32.mrb[25].mxu0 }
 0x1af   : > { %v3194_v11 = vpop.f32.mrb[58].mxu1 }
 0x1b0   : > { %v1252_v41 = vpop.f32.mrb[26].mxu0  ;;  %v1109_v14 = vpop.f32.mrb[59].mxu1 }
 0x1b1   : > { %v3197_v18 = vadd.f32 %v1252_v41, %v3134_v55  ;;  %v1254_v16 = vpop.f32.mrb[27].mxu0 }
 0x1b3   : > { %v3199_v5 = vpop.f32.mrb[60].mxu1 }
 0x1b4   : > { %v1257_v52 = vpop.f32.mrb[28].mxu0  ;;  %v1114_v19 = vpop.f32.mrb[61].mxu1 }
 0x1b5   : > { %v3202_v22 = vadd.f32 %v1257_v52, %v3136_v36  ;;  %v1259_v25 = vpop.f32.mrb[29].mxu0  ;;  %v3215_v36 = vld [vmem:[%s3344_s2] ss:$0 sm:$0xff] }
 0x1b7   : > { %v3204_v44 = vpop.f32.mrb[62].mxu1 }
 0x1b8   : > { %v1262_v13 = vpop.f32.mrb[30].mxu0  ;;  %v1119_v26 = vpop.f32.mrb[63].mxu1 }
 0x1b9   : > { %v3207_v31 = vadd.f32 %v1262_v13, %v3138_v59  ;;  %v1264_v32 = vpop.f32.mrb[31].mxu0 }
 0x1bb   : > { %v1983_v55 = vpop.f32.mrb[64].mxu1 }
 0x1bc   : > { %v1267_v23 = vpop.f32.mrb[32].mxu0  ;;  %v1418_v20 = vadd.f32 %v2238_v17, %v1983_v55  ;;  %v1412_v29 = vpop.f32.mrb[65].mxu1 }
 0x1bd   : > { %v3210_v38 = vadd.f32 %v1267_v23, %v3140_v50  ;;  %v1269_v27 = vpop.f32.mrb[33].mxu0  ;;  %v1413_v37 = vadd.f32 %v3157_v15, %v1412_v29 }
 0x1be   : > { %v1678_v59 = vadd.f32 %v3215_v36, %v1418_v20 }
 0x1bf   : > { %v1986_v45 = vpop.f32.mrb[66].mxu1  ;;  %v1677_v50 = vadd.f32 %v3215_v36, %v1413_v37 }
 0x1c0   : > { %v1272_v39 = vpop.f32.mrb[34].mxu0  ;;  %v1428_v40 = vadd.f32 %v3161_v24, %v1986_v45  ;;  %v1422_v17 = vpop.f32.mrb[67].mxu1  ;;  %v1710_v54 = vmax.f32 %v1678_v59, 0.0 }
 0x1c1   : > { %v3228_v49 = vadd.f32 %v1272_v39, %v3142_v61  ;;  %v1274_v15 = vpop.f32.mrb[35].mxu0  ;;  %v1423_v43 = vadd.f32 %v3159_v21, %v1422_v17  ;;  %v1709_v46 = vmax.f32 %v1677_v50, 0.0 }
 0x1c2   : > { %1742 = vst [vmem:[%s3224_s26 + $0x8] sm:$0xff] %v1710_v54  ;;  %v1680_v58 = vadd.f32 %v3215_v36, %v1428_v40 }
 0x1c3   : > { %v1989_v24 = vpop.f32.mrb[68].mxu1  ;;  %1741 = vst [vmem:[%s3224_s26] sm:$0xff] %v1709_v46  ;;  %v1679_v48 = vadd.f32 %v3215_v36, %v1423_v43 }
 0x1c4   : > { %v1277_v3 = vpop.f32.mrb[36].mxu0  ;;  %v1438_v60 = vadd.f32 %v3165_v33, %v1989_v24  ;;  %v1432_v1 = vpop.f32.mrb[69].mxu1  ;;  %v1712_v10 = vmax.f32 %v1680_v58, 0.0 }
 0x1c5   : > { %v3237_v61 = vadd.f32 %v1277_v3, %v3144_v0  ;;  %v1279_v6 = vpop.f32.mrb[37].mxu0  ;;  %v1433_v21 = vadd.f32 %v3163_v28, %v1432_v1  ;;  %v1711_v41 = vmax.f32 %v1679_v48, 0.0 }
 0x1c6   : > { %1744 = vst [vmem:[%s3224_s26 + $0x18] sm:$0xff] %v1712_v10  ;;  %v1682_v16 = vadd.f32 %v3215_v36, %v1438_v60 }
 0x1c7   : > { %v1992_v14 = vpop.f32.mrb[70].mxu1  ;;  %1743 = vst [vmem:[%s3224_s26 + $0x10] sm:$0xff] %v1711_v41  ;;  %v1681_v25 = vadd.f32 %v3215_v36, %v1433_v21 }
 0x1c8   : > { %v1282_v52 = vpop.f32.mrb[38].mxu0  ;;  %v1448_v33 = vadd.f32 %v3169_v30, %v1992_v14  ;;  %v1442_v19 = vpop.f32.mrb[71].mxu1  ;;  %v1714_v26 = vmax.f32 %v1682_v16, 0.0 }
 0x1c9   : > { %v3246_v0 = vadd.f32 %v1282_v52, %v3146_v2  ;;  %v1284_v13 = vpop.f32.mrb[39].mxu0  ;;  %v1443_v28 = vadd.f32 %v3167_v35, %v1442_v19  ;;  %v1713_v32 = vmax.f32 %v1681_v25, 0.0 }
 0x1ca   : > { %1746 = vst [vmem:[%s3224_s26 + $0x28] sm:$0xff] %v1714_v26  ;;  %v1684_v23 = vadd.f32 %v3215_v36, %v1448_v33 }
 0x1cb   : > { %v1995_v55 = vpop.f32.mrb[72].mxu1  ;;  %1745 = vst [vmem:[%s3224_s26 + $0x20] sm:$0xff] %v1713_v32  ;;  %v1683_v27 = vadd.f32 %v3215_v36, %v1443_v28 }
 0x1cc   : > { %v1287_v20 = vpop.f32.mrb[40].mxu0  ;;  %v1458_v30 = vadd.f32 %v3177_v51, %v1995_v55  ;;  %v1452_v29 = vpop.f32.mrb[73].mxu1  ;;  %v1716_v45 = vmax.f32 %v1684_v23, 0.0 }
 0x1cd   : > { %v3255_v2 = vadd.f32 %v1287_v20, %v3148_v4  ;;  %v1289_v37 = vpop.f32.mrb[41].mxu0  ;;  %v1453_v35 = vadd.f32 %v3173_v47, %v1452_v29  ;;  %v1715_v59 = vmax.f32 %v1683_v27, 0.0 }
 0x1ce   : > { %1748 = vst [vmem:[%s3224_s26 + $0x38] sm:$0xff] %v1716_v45  ;;  %v1686_v40 = vadd.f32 %v3215_v36, %v1458_v30 }
 0x1cf   : > { %v1998_v39 = vpop.f32.mrb[74].mxu1  ;;  %1747 = vst [vmem:[%s3224_s26 + $0x30] sm:$0xff] %v1715_v59  ;;  %v1685_v15 = vadd.f32 %v3215_v36, %v1453_v35 }
 0x1d0   : > { %v1292_v17 = vpop.f32.mrb[42].mxu0  ;;  %v1468_v51 = vadd.f32 %v3187_v63, %v1998_v39  ;;  %v1462_v50 = vpop.f32.mrb[75].mxu1  ;;  %v1718_v54 = vmax.f32 %v1686_v40, 0.0 }
 0x1d1   : > { %v2258_v4 = vadd.f32 %v1292_v17, %v3150_v12  ;;  %v1294_v43 = vpop.f32.mrb[43].mxu0  ;;  %v1463_v47 = vadd.f32 %v3182_v57, %v1462_v50  ;;  %v1717_v46 = vmax.f32 %v1685_v15, 0.0 }
 0x1d2   : > { %1750 = vst [vmem:[%s3224_s26 + $0x48] sm:$0xff] %v1718_v54  ;;  %v1688_v58 = vadd.f32 %v3215_v36, %v1468_v51 }
 0x1d3   : > { %v2001_v24 = vpop.f32.mrb[76].mxu1  ;;  %1749 = vst [vmem:[%s3224_s26 + $0x40] sm:$0xff] %v1717_v46  ;;  %v1687_v1 = vadd.f32 %v3215_v36, %v1463_v47 }
 0x1d4   : > { %v1297_v3 = vpop.f32.mrb[44].mxu0  ;;  %v1478_v63 = vadd.f32 %v3197_v18, %v2001_v24  ;;  %v1472_v60 = vpop.f32.mrb[77].mxu1  ;;  %v1720_v6 = vmax.f32 %v1688_v58, 0.0 }
 0x1d5   : > { %v3271_v12 = vadd.f32 %v1297_v3, %v3152_v9  ;;  %v1299_v48 = vpop.f32.mrb[45].mxu0  ;;  %v1473_v57 = vadd.f32 %v3192_v7, %v1472_v60  ;;  %v1719_v21 = vmax.f32 %v1687_v1, 0.0 }
 0x1d6   : > { %1752 = vst [vmem:[%s3224_s26 + $0x58] sm:$0xff] %v1720_v6  ;;  %v1690_v41 = vadd.f32 %v3215_v36, %v1478_v63 }
 0x1d7   : > { %v2004_v10 = vpop.f32.mrb[78].mxu1  ;;  %1751 = vst [vmem:[%s3224_s26 + $0x50] sm:$0xff] %v1719_v21  ;;  %v1689_v52 = vadd.f32 %v3215_v36, %v1473_v57 }
 0x1d8   : > { %v1302_v14 = vpop.f32.mrb[46].mxu0  ;;  %v1488_v18 = vadd.f32 %v3207_v31, %v2004_v10  ;;  %v1482_v16 = vpop.f32.mrb[79].mxu1  ;;  %v1722_v19 = vmax.f32 %v1690_v41, 0.0 }
 0x1d9   : > { %v2260_v9 = vadd.f32 %v1302_v14, %v3154_v62  ;;  %v1304_v33 = vpop.f32.mrb[47].mxu0  ;;  %v1483_v7 = vadd.f32 %v3202_v22, %v1482_v16  ;;  %v1721_v25 = vmax.f32 %v1689_v52, 0.0 }
 0x1da   : > { %1754 = vst [vmem:[%s3224_s26 + $0x68] sm:$0xff] %v1722_v19  ;;  %v1692_v28 = vadd.f32 %v3215_v36, %v1488_v18 }
 0x1db   : > { %v2007_v13 = vpop.f32.mrb[80].mxu1  ;;  %1753 = vst [vmem:[%s3224_s26 + $0x60] sm:$0xff] %v1721_v25  ;;  %v1691_v55 = vadd.f32 %v3215_v36, %v1483_v7 }
 0x1dc   : > { %v1307_v26 = vpop.f32.mrb[48].mxu0  ;;  %v1498_v31 = vadd.f32 %v3228_v49, %v2007_v13  ;;  %v1492_v32 = vpop.f32.mrb[81].mxu1  ;;  %v1724_v20 = vmax.f32 %v1692_v28, 0.0 }
 0x1dd   : > { %v2261_v62 = vadd.f32 %v1307_v26, %v3171_v42  ;;  %v1309_v23 = vpop.f32.mrb[49].mxu0  ;;  %v1493_v22 = vadd.f32 %v3210_v38, %v1492_v32  ;;  %v1723_v30 = vmax.f32 %v1691_v55, 0.0 }
 0x1de   : > { %1756 = vst [vmem:[%s3224_s26 + $0x78] sm:$0xff] %v1724_v20  ;;  %v1694_v27 = vadd.f32 %v3215_v36, %v1498_v31 }
 0x1df   : > { %v2010_v29 = vpop.f32.mrb[82].mxu1  ;;  %1755 = vst [vmem:[%s3224_s26 + $0x70] sm:$0xff] %v1723_v30  ;;  %v1693_v45 = vadd.f32 %v3215_v36, %v1493_v22 }
 0x1e0   : > { %v1312_v37 = vpop.f32.mrb[50].mxu0  ;;  %v1508_v49 = vadd.f32 %v3246_v0, %v2010_v29  ;;  %v1502_v35 = vpop.f32.mrb[83].mxu1  ;;  %v1726_v39 = vmax.f32 %v1694_v27, 0.0 }
 0x1e1   : > { %v2262_v42 = vadd.f32 %v1312_v37, %v3175_v34  ;;  %v1314_v59 = vpop.f32.mrb[51].mxu0  ;;  %v1503_v38 = vadd.f32 %v3237_v61, %v1502_v35  ;;  %v1725_v40 = vmax.f32 %v1693_v45, 0.0 }
 0x1e2   : > { %1758 = vst [vmem:[%s3224_s26 + $0x88] sm:$0xff] %v1726_v39  ;;  %v1696_v51 = vadd.f32 %v3215_v36, %v1508_v49 }
 0x1e3   : > { %v2013_v17 = vpop.f32.mrb[84].mxu1  ;;  %1757 = vst [vmem:[%s3224_s26 + $0x80] sm:$0xff] %v1725_v40  ;;  %v1695_v43 = vadd.f32 %v3215_v36, %v1503_v38 }
 0x1e4   : > { %v1317_v50 = vpop.f32.mrb[52].mxu0  ;;  %v1518_v15 = vadd.f32 %v2258_v4, %v2013_v17  ;;  %v1512_v0 = vpop.f32.mrb[85].mxu1  ;;  %v1728_v61 = vmax.f32 %v1696_v51, 0.0 }
 0x1e5   : > { %v2263_v47 = vadd.f32 %v1317_v50, %v3179_v53  ;;  %v1319_v34 = vpop.f32.mrb[53].mxu0  ;;  %v1513_v54 = vadd.f32 %v3255_v2, %v1512_v0  ;;  %v1727_v46 = vmax.f32 %v1695_v43, 0.0 }
 0x1e6   : > { %1760 = vst [vmem:[%s3224_s26 + $0x98] sm:$0xff] %v1728_v61  ;;  %v1698_v58 = vadd.f32 %v3215_v36, %v1518_v15 }
 0x1e7   : > { %v2016_v24 = vpop.f32.mrb[86].mxu1  ;;  %1759 = vst [vmem:[%s3224_s26 + $0x90] sm:$0xff] %v1727_v46  ;;  %v1697_v60 = vadd.f32 %v3215_v36, %v1513_v54 }
 0x1e8   : > { %v1322_v3 = vpop.f32.mrb[54].mxu0  ;;  %v1528_v63 = vadd.f32 %v2260_v9, %v2016_v24  ;;  %v1522_v4 = vpop.f32.mrb[87].mxu1  ;;  %v1730_v2 = vmax.f32 %v1698_v58, 0.0 }
 0x1e9   : > { %v2264_v1 = vadd.f32 %v1322_v3, %v3184_v8  ;;  %v1324_v53 = vpop.f32.mrb[55].mxu0  ;;  %v1523_v48 = vadd.f32 %v3271_v12, %v1522_v4  ;;  %v1729_v57 = vmax.f32 %v1697_v60, 0.0 }
 0x1ea   : > { %1762 = vst [vmem:[%s3224_s26 + $0xa8] sm:$0xff] %v1730_v2  ;;  %v1700_v21 = vadd.f32 %v3215_v36, %v1528_v63 }
 0x1eb   : > { %v2019_v6 = vpop.f32.mrb[88].mxu1  ;;  %1761 = vst [vmem:[%s3224_s26 + $0xa0] sm:$0xff] %v1729_v57  ;;  %v1699_v18 = vadd.f32 %v3215_v36, %v1523_v48 }
 0x1ec   : > { %v1327_v10 = vpop.f32.mrb[56].mxu0  ;;  %v1538_v41 = vadd.f32 %v2262_v42, %v2019_v6  ;;  %v1532_v14 = vpop.f32.mrb[89].mxu1  ;;  %v1732_v9 = vmax.f32 %v1700_v21, 0.0 }
 0x1ed   : > { %v2265_v16 = vadd.f32 %v1327_v10, %v3189_v56  ;;  %v1329_v8 = vpop.f32.mrb[57].mxu0  ;;  %v1533_v52 = vadd.f32 %v2261_v62, %v1532_v14  ;;  %v1731_v12 = vmax.f32 %v1699_v18, 0.0 }
 0x1ee   : > { %1764 = vst [vmem:[%s3224_s26 + $0xb8] sm:$0xff] %v1732_v9  ;;  %v1702_v7 = vadd.f32 %v3215_v36, %v1538_v41 }
 0x1ef   : > { %v2022_v33 = vpop.f32.mrb[90].mxu1  ;;  %1763 = vst [vmem:[%s3224_s26 + $0xb0] sm:$0xff] %v1731_v12  ;;  %v1701_v28 = vadd.f32 %v3215_v36, %v1533_v52 }
 0x1f0   : > { %v1332_v19 = vpop.f32.mrb[58].mxu0  ;;  %v1548_v25 = vadd.f32 %v2264_v1, %v2022_v33  ;;  %v1542_v13 = vpop.f32.mrb[91].mxu1  ;;  %v1734_v32 = vmax.f32 %v1702_v7, 0.0 }
 0x1f1   : > { %v2266_v26 = vadd.f32 %v1332_v19, %v3194_v11  ;;  %v1334_v31 = vpop.f32.mrb[59].mxu0  ;;  %v1543_v56 = vadd.f32 %v2263_v47, %v1542_v13  ;;  %v1733_v55 = vmax.f32 %v1701_v28, 0.0 }
 0x1f2   : > { %1766 = vst [vmem:[%s3224_s26 + $0xc8] sm:$0xff] %v1734_v32  ;;  %v1704_v23 = vadd.f32 %v3215_v36, %v1548_v25 }
 0x1f3   : > { %v2025_v62 = vpop.f32.mrb[92].mxu1  ;;  %1765 = vst [vmem:[%s3224_s26 + $0xc0] sm:$0xff] %v1733_v55  ;;  %v1703_v29 = vadd.f32 %v3215_v36, %v1543_v56 }
 0x1f4   : > { %v1337_v22 = vpop.f32.mrb[60].mxu0  ;;  %v1558_v20 = vadd.f32 %v2266_v26, %v2025_v62  ;;  %v1552_v30 = vpop.f32.mrb[93].mxu1  ;;  %v1736_v49 = vmax.f32 %v1704_v23, 0.0 }
 0x1f5   : > { %v2267_v27 = vadd.f32 %v1337_v22, %v3199_v5  ;;  %v1339_v37 = vpop.f32.mrb[61].mxu0  ;;  %v1553_v11 = vadd.f32 %v2265_v16, %v1552_v30  ;;  %v1735_v35 = vmax.f32 %v1703_v29, 0.0 }
 0x1f6   : > { %1768 = vst [vmem:[%s3224_s26 + $0xd8] sm:$0xff] %v1736_v49  ;;  %v1706_v42 = vadd.f32 %v3215_v36, %v1558_v20 }
 0x1f7   : > { %v2028_v45 = vpop.f32.mrb[94].mxu1  ;;  %1767 = vst [vmem:[%s3224_s26 + $0xd0] sm:$0xff] %v1735_v35  ;;  %v1705_v39 = vadd.f32 %v3215_v36, %v1553_v11 }
 0x1f8   : > { %v1342_v59 = vpop.f32.mrb[62].mxu0  ;;  %v1562_v38 = vpop.f32.mrb[95].mxu1  ;;  %v1738_v51 = vmax.f32 %v1706_v42, 0.0 }
 0x1f9   : > { %v2268_v40 = vadd.f32 %v1342_v59, %v3204_v44  ;;  %v1344_v5 = vpop.f32.mrb[63].mxu0  ;;  %v1563_v17 = vadd.f32 %v2267_v27, %v1562_v38  ;;  %v1737_v50 = vmax.f32 %v1705_v39, 0.0 }
 0x1fa   : > { %1770 = vst [vmem:[%s3224_s26 + $0xe8] sm:$0xff] %v1738_v51 }
 0x1fb   : > { %v1568_v15 = vadd.f32 %v2268_v40, %v2028_v45  ;;  %1769 = vst [vmem:[%s3224_s26 + $0xe0] sm:$0xff] %v1737_v50  ;;  %v1707_v0 = vadd.f32 %v3215_v36, %v1563_v17 }
 0x1fd   : > { %v1708_v43 = vadd.f32 %v3215_v36, %v1568_v15  ;;  %v1739_v47 = vmax.f32 %v1707_v0, 0.0 }
 0x1ff   : > { %v1740_v34 = vmax.f32 %v1708_v43, 0.0  ;;  %1771 = vst [vmem:[%s3224_s26 + $0xf0] sm:$0xff] %v1739_v47 }
 0x201   : > { %1772 = vst [vmem:[%s3224_s26 + $0xf8] sm:$0xff] %v1740_v34 }
 0x202 PF: > { %s13_s14 = sadd.s32 1, %s2382_s14   ;;  %s3346_s12 = smov %s2378_s13 }
 0x203   : > { %p10_p5 = scmp.ge.s32.totalorder %s13_s14, 4   ;;  %s3347_s13 = smov %s3349_s15 }
 0x205   :  { %12 = sbr.rel (!%p10_p5) target bundleno = 2 (0x2), region = 76 }

</bundles_post_ra>
